<compile_context>
chip_gen: v7x
topology: tpu7x:2x2x1
jax: 0.10.0
libtpu: 0.0.40
codegen_flags: <defaults>
</compile_context>

<pallas_src>
import functools
import numpy as np
import jax
import jax.numpy as jnp
from jax import lax
from jax.experimental import pallas as pl
from jax.experimental.pallas import tpu as pltpu


def _round_up(x, m):
    return ((x + m - 1) // m) * m


def _compute_vmem_limit():
    # Generation-aware scoped-VMEM budget: ~75% of physical, capped at 96 MiB.
    #   v7x  (64 MiB physical)   -> 48 MiB
    #   v5e/v6e (128 MiB)        -> 96 MiB
    try:
        cap = int(pltpu.get_tpu_info().vmem_capacity_bytes)
    except Exception:
        cap = 64 * 1024 * 1024
    return int(min(cap * 3 // 4, 96 * 1024 * 1024))


_VMEM_LIMIT = _compute_vmem_limit()


# ----------------------------- Pallas kernels -----------------------------

def _linear_kernel_single_k(x_ref, w_ref, b_ref, o_ref, *, relu):
    """K fits one tile: no scratch accumulator, store dot + bias (+ReLU) directly."""
    y = jnp.dot(x_ref[...], w_ref[...], preferred_element_type=jnp.float32) + b_ref[...]
    if relu:
        y = jnp.maximum(y, 0.0)
    o_ref[...] = y.astype(o_ref.dtype)


def _linear_kernel_multi_k(x_ref, w_ref, b_ref, o_ref, acc_ref, *, relu):
    """K-tiled matmul: bf16 MXU inputs, f32 VMEM accumulator, fused bias/ReLU."""
    kk = pl.program_id(2)

    @pl.when(kk == 0)
    def _():
        acc_ref[...] = jnp.zeros_like(acc_ref)

    acc_ref[...] += jnp.dot(x_ref[...], w_ref[...], preferred_element_type=jnp.float32)

    @pl.when(kk == pl.num_programs(2) - 1)
    def _():
        y = acc_ref[...] + b_ref[...]
        if relu:
            y = jnp.maximum(y, 0.0)
        o_ref[...] = y.astype(o_ref.dtype)


def pallas_linear(x, w, b, *, relu=False, out_dtype=jnp.bfloat16,
                  tm=256, tn=256, tk=512):
    """x: (M, K), w: (K, N) bf16, b: (N,) f32 -> (M, N) out_dtype.

    Lane-dense output (N padded to a multiple of 128), bf16 MXU inputs with f32
    accumulation, BlockSpec auto-pipelining. Single-K fast path has no scratch.
    """
    M, K = x.shape
    N = w.shape[1]

    Mp = _round_up(M, 8)
    tm_ = min(tm, Mp)
    Mp = _round_up(Mp, tm_)

    Np = _round_up(N, 128)
    tn_ = min(tn, Np)
    Np = _round_up(Np, tn_)

    if K <= tk:
        Kp, tk_ = K, K
    else:
        tk_ = tk
        Kp = _round_up(K, tk_)

    xb = x.astype(jnp.bfloat16)      # no-op when activations are already bf16
    wb = w.astype(jnp.bfloat16)      # no-op: weights pre-cast at prepare time
    if (Mp, Kp) != (M, K):
        xb = jnp.pad(xb, ((0, Mp - M), (0, Kp - K)))
    if (Kp, Np) != (K, N):
        wb = jnp.pad(wb, ((0, Kp - K), (0, Np - N)))
    bp = b.astype(jnp.float32)
    if Np != N:
        bp = jnp.pad(bp, (0, Np - N))
    bp = bp.reshape(1, Np)

    n_k = Kp // tk_
    if n_k == 1:
        out = pl.pallas_call(
            functools.partial(_linear_kernel_single_k, relu=relu),
            out_shape=jax.ShapeDtypeStruct((Mp, Np), out_dtype),
            grid=(Mp // tm_, Np // tn_),
            in_specs=[pl.BlockSpec((tm_, tk_), lambda i, j: (i, 0)),
                      pl.BlockSpec((tk_, tn_), lambda i, j: (0, j)),
                      pl.BlockSpec((1, tn_), lambda i, j: (0, j))],
            out_specs=pl.BlockSpec((tm_, tn_), lambda i, j: (i, j)),
            compiler_params=pltpu.CompilerParams(
                dimension_semantics=("parallel", "parallel"),
                vmem_limit_bytes=_VMEM_LIMIT),
        )(xb, wb, bp)
    else:
        out = pl.pallas_call(
            functools.partial(_linear_kernel_multi_k, relu=relu),
            out_shape=jax.ShapeDtypeStruct((Mp, Np), out_dtype),
            grid=(Mp // tm_, Np // tn_, n_k),
            in_specs=[pl.BlockSpec((tm_, tk_), lambda i, j, kk: (i, kk)),
                      pl.BlockSpec((tk_, tn_), lambda i, j, kk: (kk, j)),
                      pl.BlockSpec((1, tn_), lambda i, j, kk: (0, j))],
            out_specs=pl.BlockSpec((tm_, tn_), lambda i, j, kk: (i, j)),
            scratch_shapes=[pltpu.VMEM((tm_, tn_), jnp.float32)],
            compiler_params=pltpu.CompilerParams(
                dimension_semantics=("parallel", "parallel", "arbitrary"),
                vmem_limit_bytes=_VMEM_LIMIT),
        )(xb, wb, bp)

    if (Mp, Np) != (M, N):
        out = out[:M, :N]
    return out


def _add_ln_kernel(x_ref, r_ref, g_ref, b_ref, o_ref):
    """Fused residual add + LayerNorm (eps=1e-12, biased variance), f32 math."""
    x = x_ref[...].astype(jnp.float32) + r_ref[...].astype(jnp.float32)
    mean = jnp.mean(x, axis=-1, keepdims=True)
    var = jnp.mean(jnp.square(x - mean), axis=-1, keepdims=True)
    y = (x - mean) * lax.rsqrt(var + 1e-12) * g_ref[...] + b_ref[...]
    o_ref[...] = y.astype(o_ref.dtype)


def pallas_add_layernorm(x, res, gamma, beta, *, out_dtype=jnp.bfloat16, tm=512):
    """x, res: (M, D) -> LayerNorm(x + res) over last dim, row-tiled."""
    M, D = x.shape
    Mp = _round_up(M, 8)
    tm_ = min(tm, Mp)
    Mp = _round_up(Mp, tm_)

    xp, rp = x, res
    if Mp != M:
        xp = jnp.pad(x, ((0, Mp - M), (0, 0)))
        rp = jnp.pad(res, ((0, Mp - M), (0, 0)))

    out = pl.pallas_call(
        _add_ln_kernel,
        out_shape=jax.ShapeDtypeStruct((Mp, D), out_dtype),
        grid=(Mp // tm_,),
        in_specs=[pl.BlockSpec((tm_, D), lambda i: (i, 0)),
                  pl.BlockSpec((tm_, D), lambda i: (i, 0)),
                  pl.BlockSpec((1, D), lambda i: (0, 0)),
                  pl.BlockSpec((1, D), lambda i: (0, 0))],
        out_specs=pl.BlockSpec((tm_, D), lambda i: (i, 0)),
        compiler_params=pltpu.CompilerParams(
            dimension_semantics=("parallel",),
            vmem_limit_bytes=_VMEM_LIMIT),
    )(xp, rp, gamma.reshape(1, D), beta.reshape(1, D))

    return out[:M] if Mp != M else out


def _attention_kernel(q_ref, k_ref, v_ref, qm_ref, km_ref, o_ref, *, n_head, causal):
    """All-heads attention for one (batch, q_tile) grid step.

    q_ref : (1, tq, D) bf16 (already scaled by 1/sqrt(d_head) via Wq folding)
    k_ref : (1, Sk, D) bf16
    v_ref : (1, Sk, D) bf16
    qm_ref: (1, tq, 1) f32 pad mask on queries (1 = keep)
    km_ref: (1, 1, Sk) f32 pad mask on keys    (1 = keep)
    o_ref : (1, tq, D) out_dtype
    """
    tq, D = q_ref.shape[1], q_ref.shape[2]
    Sk = k_ref.shape[1]
    dh = D // n_head

    q = q_ref[0]                       # (tq, D) bf16
    k = k_ref[0]                       # (Sk, D) bf16
    v = v_ref[0]                       # (Sk, D) bf16

    # Hoisted additive mask bias — computed once and reused by every head.
    keep = qm_ref[0] * km_ref[0]       # (tq, Sk) f32 via broadcast
    if causal:
        q_tile = pl.program_id(1)
        row = lax.broadcasted_iota(jnp.int32, (tq, Sk), 0) + q_tile * tq
        col = lax.broadcasted_iota(jnp.int32, (tq, Sk), 1)
        keep = keep * (col <= row).astype(jnp.float32)
    bias = jnp.where(keep > 0.5, 0.0, -10000.0)      # (tq, Sk) f32

    dn = (((1,), (1,)), ((), ()))      # contract the d_head axis of q_h / k_h
    for h in range(n_head):            # static unroll; per-head store below
        sl = slice(h * dh, (h + 1) * dh)
        s = lax.dot_general(q[:, sl], k[:, sl], dn,
                            preferred_element_type=jnp.float32) + bias   # (tq, Sk)
        m = jnp.max(s, axis=-1, keepdims=True)
        e = jnp.exp(s - m)
        p = e * pl.reciprocal(jnp.sum(e, axis=-1, keepdims=True), approx=True)
        o_h = jnp.dot(p.astype(v.dtype), v[:, sl],
                      preferred_element_type=jnp.float32)                # (tq, dh)
        # Store each head as it is produced: no trailing concat / vreg pile-up.
        o_ref[0, :, sl] = o_h.astype(o_ref.dtype)


def pallas_attention(q, k, v, q_mask, k_mask, *, n_head, causal,
                     out_dtype=jnp.bfloat16, tq=256):
    """q: (B, Sq, D) bf16, k/v: (B, Sk, D) bf16,
    q_mask: (B, Sq, 1) f32, k_mask: (B, 1, Sk) f32 -> (B, Sq, D) out_dtype."""
    B, Sq, D = q.shape
    Sk = k.shape[1]

    Sq8 = _round_up(Sq, 8)
    tq_ = min(tq, Sq8)
    Sqp = _round_up(Sq8, tq_)
    if Sqp != Sq:
        q = jnp.pad(q, ((0, 0), (0, Sqp - Sq), (0, 0)))
        q_mask = jnp.pad(q_mask, ((0, 0), (0, Sqp - Sq), (0, 0)))

    kern = functools.partial(_attention_kernel, n_head=n_head, causal=causal)
    out = pl.pallas_call(
        kern,
        out_shape=jax.ShapeDtypeStruct((B, Sqp, D), out_dtype),
        grid=(B, Sqp // tq_),
        in_specs=[pl.BlockSpec((1, tq_, D), lambda b, i: (b, i, 0)),
                  pl.BlockSpec((1, Sk, D), lambda b, i: (b, 0, 0)),
                  pl.BlockSpec((1, Sk, D), lambda b, i: (b, 0, 0)),
                  pl.BlockSpec((1, tq_, 1), lambda b, i: (b, i, 0)),
                  pl.BlockSpec((1, 1, Sk), lambda b, i: (b, 0, 0))],
        out_specs=pl.BlockSpec((1, tq_, D), lambda b, i: (b, i, 0)),
        compiler_params=pltpu.CompilerParams(
            dimension_semantics=("parallel", "parallel"),
            vmem_limit_bytes=_VMEM_LIMIT),
    )(q, k, v, q_mask, k_mask)
    # TODO(synk): for very long Sk convert to the flash (q_tile, kv_tile)
    # online-softmax form with m/l/acc scratch so the (tq, Sk) scores and the
    # full K/V blocks do not have to fit VMEM (matters first on v7x's 64 MiB).
    return out[:, :Sq] if Sqp != Sq else out


# ----------------------------- parameter init -----------------------------

def init_linear_params(key, fan_in, fan_out):
    kw, kb = jax.random.split(key)
    bound = 1.0 / np.sqrt(fan_in)
    w = jax.random.uniform(kw, (fan_in, fan_out), jnp.float32, -bound, bound)
    b = jax.random.uniform(kb, (fan_out,), jnp.float32, -bound, bound)
    return {"w": w, "b": b}


def init_mha(key, d_model):
    ks = jax.random.split(key, 4)
    return {"q": init_linear_params(ks[0], d_model, d_model),
            "k": init_linear_params(ks[1], d_model, d_model),
            "v": init_linear_params(ks[2], d_model, d_model),
            "o": init_linear_params(ks[3], d_model, d_model)}


def init_ln(d_model):
    return {"g": jnp.ones((d_model,), jnp.float32),
            "b": jnp.zeros((d_model,), jnp.float32)}


def init_ffn(key, d_model, hidden):
    k1, k2 = jax.random.split(key)
    return {"l1": init_linear_params(k1, d_model, hidden),
            "l2": init_linear_params(k2, hidden, d_model)}


def init_encoder_layer(key, d_model, hidden):
    k1, k2 = jax.random.split(key)
    return {"attn": init_mha(k1, d_model), "norm1": init_ln(d_model),
            "ffn": init_ffn(k2, d_model, hidden), "norm2": init_ln(d_model)}


def init_decoder_layer(key, d_model, hidden):
    k1, k2, k3 = jax.random.split(key, 3)
    return {"self_attn": init_mha(k1, d_model), "norm1": init_ln(d_model),
            "cross_attn": init_mha(k2, d_model), "norm2": init_ln(d_model),
            "ffn": init_ffn(k3, d_model, hidden), "norm3": init_ln(d_model)}


def sinusoidal_pos_encoding(max_len, d_model):
    pos = jnp.arange(max_len, dtype=jnp.float32)[:, None]
    i2 = jnp.arange(0, d_model, 2, dtype=jnp.float32)
    angle = pos / jnp.power(10000.0, i2 / d_model)
    pe = jnp.zeros((max_len, d_model), jnp.float32)
    pe = pe.at[:, 0::2].set(jnp.sin(angle))
    pe = pe.at[:, 1::2].set(jnp.cos(angle))
    return pe


def init_transformer_params(key, *, d_model, n_head, max_len, ffn_hidden,
                            n_layer, enc_voc_size, dec_voc_size):
    keys = jax.random.split(key, 3 + 2 * n_layer)
    return {
        "enc_tok_emb": jax.random.normal(keys[0], (enc_voc_size, d_model), jnp.float32),
        "dec_tok_emb": jax.random.normal(keys[1], (dec_voc_size, d_model), jnp.float32),
        "pos_enc": sinusoidal_pos_encoding(max_len, d_model),
        "enc_layers": [init_encoder_layer(keys[3 + i], d_model, ffn_hidden)
                       for i in range(n_layer)],
        "dec_layers": [init_decoder_layer(keys[3 + n_layer + i], d_model, ffn_hidden)
                       for i in range(n_layer)],
        "final": init_linear_params(keys[2], d_model, dec_voc_size),
    }


# ------------------- one-time inference parameter prep -------------------

def _prep_proj(lin):
    return {"w": lin["w"].astype(jnp.bfloat16), "b": lin["b"].astype(jnp.float32)}


def _prep_mha_self(m, scale):
    # Fused QKV projection weights; 1/sqrt(d_head) folded into Wq/bq.
    wqkv = jnp.concatenate([m["q"]["w"] * scale, m["k"]["w"], m["v"]["w"]], axis=1)
    bqkv = jnp.concatenate([m["q"]["b"] * scale, m["k"]["b"], m["v"]["b"]], axis=0)
    return {"wqkv": wqkv.astype(jnp.bfloat16), "bqkv": bqkv.astype(jnp.float32),
            "o": _prep_proj(m["o"])}


def _prep_mha_cross(m, scale):
    # Q separate (queries come from the decoder), fused KV from the encoder.
    wkv = jnp.concatenate([m["k"]["w"], m["v"]["w"]], axis=1)
    bkv = jnp.concatenate([m["k"]["b"], m["v"]["b"]], axis=0)
    return {"wq": (m["q"]["w"] * scale).astype(jnp.bfloat16),
            "bq": (m["q"]["b"] * scale).astype(jnp.float32),
            "wkv": wkv.astype(jnp.bfloat16), "bkv": bkv.astype(jnp.float32),
            "o": _prep_proj(m["o"])}


def prepare_transformer_params(params, *, n_head):
    """Fuse/cast/scale all weights once, outside the per-step forward."""
    d_model = params["enc_tok_emb"].shape[1]
    scale = 1.0 / np.sqrt(d_model // n_head)

    def prep_ffn(f):
        return {"l1": _prep_proj(f["l1"]), "l2": _prep_proj(f["l2"])}

    enc_layers = [{"attn": _prep_mha_self(l["attn"], scale),
                   "norm1": l["norm1"],
                   "ffn": prep_ffn(l["ffn"]),
                   "norm2": l["norm2"]} for l in params["enc_layers"]]
    dec_layers = [{"self_attn": _prep_mha_self(l["self_attn"], scale),
                   "norm1": l["norm1"],
                   "cross_attn": _prep_mha_cross(l["cross_attn"], scale),
                   "norm2": l["norm2"],
                   "ffn": prep_ffn(l["ffn"]),
                   "norm3": l["norm3"]} for l in params["dec_layers"]]
    return {"enc_tok_emb": params["enc_tok_emb"],
            "dec_tok_emb": params["dec_tok_emb"],
            "pos_enc": params["pos_enc"],
            "enc_layers": enc_layers,
            "dec_layers": dec_layers,
            "final": _prep_proj(params["final"])}


# ----------------------------- forward (glue) -----------------------------

def mha_self_forward(p, x, q_mask, k_mask, n_head, causal):
    B, S, D = x.shape
    qkv = pallas_linear(x.reshape(B * S, D), p["wqkv"], p["bqkv"])    # bf16 (B*S, 3D)
    q = qkv[:, :D].reshape(B, S, D)
    k = qkv[:, D:2 * D].reshape(B, S, D)
    v = qkv[:, 2 * D:].reshape(B, S, D)
    o = pallas_attention(q, k, v, q_mask, k_mask, n_head=n_head, causal=causal)
    o = pallas_linear(o.reshape(B * S, D), p["o"]["w"], p["o"]["b"])
    return o.reshape(B, S, D)


def mha_cross_forward(p, x, enc, q_mask, k_mask, n_head):
    B, Sq, D = x.shape
    Sk = enc.shape[1]
    q = pallas_linear(x.reshape(B * Sq, D), p["wq"], p["bq"]).reshape(B, Sq, D)
    kv = pallas_linear(enc.reshape(B * Sk, D), p["wkv"], p["bkv"])    # bf16 (B*Sk, 2D)
    k = kv[:, :D].reshape(B, Sk, D)
    v = kv[:, D:].reshape(B, Sk, D)
    o = pallas_attention(q, k, v, q_mask, k_mask, n_head=n_head, causal=False)
    o = pallas_linear(o.reshape(B * Sq, D), p["o"]["w"], p["o"]["b"])
    return o.reshape(B, Sq, D)


def add_ln_forward(p, x, res):
    B, S, D = x.shape
    y = pallas_add_layernorm(x.reshape(B * S, D), res.reshape(B * S, D),
                             p["g"], p["b"])
    return y.reshape(B, S, D)


def ffn_forward(p, x):
    B, S, D = x.shape
    h = pallas_linear(x.reshape(B * S, D), p["l1"]["w"], p["l1"]["b"],
                      relu=True, tn=512)
    o = pallas_linear(h, p["l2"]["w"], p["l2"]["b"])
    return o.reshape(B, S, D)


def encoder_layer_forward(p, x, ones_q, src_key_mask, n_head):
    _x = x
    x = mha_self_forward(p["attn"], x, ones_q, src_key_mask, n_head, causal=False)
    x = add_ln_forward(p["norm1"], x, _x)           # dropout = identity
    _x = x
    x = ffn_forward(p["ffn"], x)
    x = add_ln_forward(p["norm2"], x, _x)
    return x


def decoder_layer_forward(p, dec, enc, trg_q_mask, ones_k_trg, ones_q_trg,
                          src_key_mask, n_head):
    _x = dec
    x = mha_self_forward(p["self_attn"], dec, trg_q_mask, ones_k_trg, n_head,
                         causal=True)
    x = add_ln_forward(p["norm1"], x, _x)
    _x = x
    x = mha_cross_forward(p["cross_attn"], x, enc, ones_q_trg, src_key_mask, n_head)
    x = add_ln_forward(p["norm2"], x, _x)
    _x = x
    x = ffn_forward(p["ffn"], x)
    x = add_ln_forward(p["norm3"], x, _x)
    return x


def embed(tok_emb, pos_enc, tokens):
    S = tokens.shape[1]
    x = tok_emb[tokens] + pos_enc[:S][None, :, :]   # dropout = identity
    return x.astype(jnp.bfloat16)


def transformer_forward(params, src, trg, *, n_head, src_pad_idx, trg_pad_idx):
    B, Ss = src.shape
    St = trg.shape[1]

    # Reference masks:
    #   src_mask = (src != pad)[:,None,None,:]        -> key-side pad mask only
    #   trg_mask = (trg != pad)[:,None,:,None] & tril -> query-side pad + causal
    # Shipped as tiny per-axis masks; the causal part is built in-kernel.
    # TODO(synk): replace these lane-sparse mask DMAs with scalar-prefetched
    # lengths only if pads are guaranteed to be a contiguous suffix.
    src_key_mask = (src != src_pad_idx).astype(jnp.float32).reshape(B, 1, Ss)
    trg_q_mask = (trg != trg_pad_idx).astype(jnp.float32).reshape(B, St, 1)
    ones_q_src = jnp.ones((B, Ss, 1), jnp.float32)
    ones_q_trg = jnp.ones((B, St, 1), jnp.float32)
    ones_k_trg = jnp.ones((B, 1, St), jnp.float32)

    # Encoder
    enc = embed(params["enc_tok_emb"], params["pos_enc"], src)
    for lp in params["enc_layers"]:
        enc = encoder_layer_forward(lp, enc, ones_q_src, src_key_mask, n_head)

    # Decoder
    dec = embed(params["dec_tok_emb"], params["pos_enc"], trg)
    for lp in params["dec_layers"]:
        dec = decoder_layer_forward(lp, dec, enc, trg_q_mask, ones_k_trg,
                                    ones_q_trg, src_key_mask, n_head)

    # Final projection to vocab (f32 logits, lane-dense N inside pallas_linear)
    Bd, Std, D = dec.shape
    out = pallas_linear(dec.reshape(Bd * Std, D),
                        params["final"]["w"], params["final"]["b"],
                        out_dtype=jnp.float32, tn=512)
    return out.reshape(B, St, -1)


# ----------------------------- demo -----------------------------

if __name__ == "__main__":
    src_pad_idx = 0
    trg_pad_idx = 0
    d_model = 32
    n_head = 4
    max_len = 16
    ffn_hidden = 64
    n_layer = 2
    drop_prob = 0.1        # dropout is identity at inference
    enc_voc_size = 50
    dec_voc_size = 50
    B, S_src, S_trg = 2, 8, 8
    assert d_model % n_head == 0

    key = jax.random.PRNGKey(0)
    kp, ks, kt = jax.random.split(key, 3)

    raw_params = init_transformer_params(
        kp, d_model=d_model, n_head=n_head, max_len=max_len,
        ffn_hidden=ffn_hidden, n_layer=n_layer,
        enc_voc_size=enc_voc_size, dec_voc_size=dec_voc_size)
    # One-time fuse / bf16-cast / scale-fold of the weights (outside the jit step).
    params = prepare_transformer_params(raw_params, n_head=n_head)

    # token ids in [1, voc); append a couple of pad tokens to exercise masks
    src = jax.random.randint(ks, (B, S_src), 1, enc_voc_size, dtype=jnp.int32)
    trg = jax.random.randint(kt, (B, S_trg), 1, dec_voc_size, dtype=jnp.int32)
    src = src.at[:, -2:].set(src_pad_idx)
    trg = trg.at[:, -1:].set(trg_pad_idx)

    fwd = jax.jit(functools.partial(transformer_forward, n_head=n_head,
                                    src_pad_idx=src_pad_idx,
                                    trg_pad_idx=trg_pad_idx))
    out = fwd(params, src, trg)
    out = jax.block_until_ready(out)

    assert out.shape == (B, S_trg, dec_voc_size)
    assert bool(jnp.all(jnp.isfinite(out)))
    print("KERNEL_OK")
</pallas_src>

<mosaic_0001>
module attributes {stable_mosaic.version = 11 : i64} {
  func.func @_linear_kernel_single_k(%arg0: i32, %arg1: i32, %arg2: memref<16x32xbf16, #tpu.memory_space<vmem>>, %arg3: memref<32x128xbf16, #tpu.memory_space<vmem>>, %arg4: memref<1x128xf32, #tpu.memory_space<vmem>>, %arg5: memref<16x128xbf16, #tpu.memory_space<vmem>>) attributes {dimension_semantics = [#tpu.dimension_semantics<parallel>, #tpu.dimension_semantics<parallel>], iteration_bounds = array<i64: 1, 1>, scalar_prefetch = 0 : i64, scratch_operands = 0 : i64, tpu.core_type = #tpu.core_type<tc>, window_params = [{transform_indices = @transform_0, window_bounds = array<i64: 16, 32>}, {transform_indices = @transform_1, window_bounds = array<i64: 32, 128>}, {transform_indices = @transform_2, window_bounds = array<i64: 1, 128>}, {transform_indices = @transform_3, window_bounds = array<i64: 16, 128>}]} {
    %c0 = arith.constant 0 : index
    %c0_0 = arith.constant 0 : index
    %0 = vector.load %arg2[%c0, %c0_0] : memref<16x32xbf16, #tpu.memory_space<vmem>>, vector<16x32xbf16>
    %c0_1 = arith.constant 0 : index
    %c0_2 = arith.constant 0 : index
    %1 = vector.load %arg3[%c0_1, %c0_2] : memref<32x128xbf16, #tpu.memory_space<vmem>>, vector<32x128xbf16>
    %cst = arith.constant dense<0.000000e+00> : vector<16x128xf32>
    %2 = tpu.matmul %0, %1, %cst {dimension_numbers = #tpu.dot_dimension_numbers<[1], [0], [0], [1], [0, 0, 1, 1], [], []>} : vector<16x32xbf16>, vector<32x128xbf16>, vector<16x128xf32> -> vector<16x128xf32>
    %c0_3 = arith.constant 0 : index
    %c0_4 = arith.constant 0 : index
    %3 = vector.load %arg4[%c0_3, %c0_4] : memref<1x128xf32, #tpu.memory_space<vmem>>, vector<1x128xf32>
    %4 = vector.broadcast %3 : vector<1x128xf32> to vector<16x128xf32>
    %5 = arith.addf %2, %4 : vector<16x128xf32>
    %6 = arith.truncf %5 : vector<16x128xf32> to vector<16x128xbf16>
    %c0_5 = arith.constant 0 : index
    %c0_6 = arith.constant 0 : index
    %7 = vector.load %arg5[%c0_5, %c0_6] : memref<16x128xbf16, #tpu.memory_space<vmem>>, vector<16x128xbf16>
    tpu.vector_store %arg5[%c0_5, %c0_6], %6 {strides = array<i32>} : memref<16x128xbf16, #tpu.memory_space<vmem>>, vector<16x128xbf16>,
    return
  }
  func.func @transform_0(%arg0: i32, %arg1: i32) -> (i32, i32) {
    %c0_i32 = arith.constant 0 : i32
    %c0_i32_0 = arith.constant 0 : i32
    return %arg0, %c0_i32 : i32, i32
  }
  func.func @transform_1(%arg0: i32, %arg1: i32) -> (i32, i32) {
    %c0_i32 = arith.constant 0 : i32
    %c0_i32_0 = arith.constant 0 : i32
    return %c0_i32, %arg1 : i32, i32
  }
  func.func @transform_2(%arg0: i32, %arg1: i32) -> (i32, i32) {
    %c0_i32 = arith.constant 0 : i32
    %c0_i32_0 = arith.constant 0 : i32
    return %c0_i32, %arg1 : i32, i32
  }
  func.func @transform_3(%arg0: i32, %arg1: i32) -> (i32, i32) {
    %c0_i32 = arith.constant 0 : i32
    return %arg0, %arg1 : i32, i32
  }
}

module attributes {stable_mosaic.version = 11 : i64} {
  func.func @_add_ln_kernel(%arg0: i32, %arg1: memref<16x32xbf16, #tpu.memory_space<vmem>>, %arg2: memref<16x32xbf16, #tpu.memory_space<vmem>>, %arg3: memref<1x32xf32, #tpu.memory_space<vmem>>, %arg4: memref<1x32xf32, #tpu.memory_space<vmem>>, %arg5: memref<16x32xbf16, #tpu.memory_space<vmem>>) attributes {dimension_semantics = [#tpu.dimension_semantics<parallel>], iteration_bounds = array<i64: 1>, scalar_prefetch = 0 : i64, scratch_operands = 0 : i64, tpu.core_type = #tpu.core_type<tc>, window_params = [{transform_indices = @transform_0, window_bounds = array<i64: 16, 32>}, {transform_indices = @transform_1, window_bounds = array<i64: 16, 32>}, {pipeline_mode = #tpu.pipeline_mode<synchronous>, transform_indices = @transform_2, window_bounds = array<i64: 1, 32>}, {pipeline_mode = #tpu.pipeline_mode<synchronous>, transform_indices = @transform_3, window_bounds = array<i64: 1, 32>}, {transform_indices = @transform_4, window_bounds = array<i64: 16, 32>}]} {
    %c0 = arith.constant 0 : index
    %c0_0 = arith.constant 0 : index
    %0 = vector.load %arg1[%c0, %c0_0] : memref<16x32xbf16, #tpu.memory_space<vmem>>, vector<16x32xbf16>
    %1 = arith.extf %0 : vector<16x32xbf16> to vector<16x32xf32>
    %c0_1 = arith.constant 0 : index
    %c0_2 = arith.constant 0 : index
    %2 = vector.load %arg2[%c0_1, %c0_2] : memref<16x32xbf16, #tpu.memory_space<vmem>>, vector<16x32xbf16>
    %3 = arith.extf %2 : vector<16x32xbf16> to vector<16x32xf32>
    %4 = arith.addf %1, %3 : vector<16x32xf32>
    %cst = arith.constant dense<0.000000e+00> : vector<16xf32>
    %5 = vector.multi_reduction <add>, %4, %cst [1] : vector<16x32xf32> to vector<16xf32>
    %6 = vector.shape_cast %5 : vector<16xf32> to vector<16x1xf32>
    %cst_3 = arith.constant 3.200000e+01 : f32
    %7 = vector.broadcast %cst_3 : f32 to vector<16x1xf32>
    %8 = arith.divf %6, %7 : vector<16x1xf32>
    %9 = vector.broadcast %8 : vector<16x1xf32> to vector<16x32xf32>
    %10 = arith.subf %4, %9 : vector<16x32xf32>
    %11 = arith.mulf %10, %10 : vector<16x32xf32>
    %cst_4 = arith.constant dense<0.000000e+00> : vector<16xf32>
    %12 = vector.multi_reduction <add>, %11, %cst_4 [1] : vector<16x32xf32> to vector<16xf32>
    %13 = vector.shape_cast %12 : vector<16xf32> to vector<16x1xf32>
    %cst_5 = arith.constant 3.200000e+01 : f32
    %14 = vector.broadcast %cst_5 : f32 to vector<16x1xf32>
    %15 = arith.divf %13, %14 : vector<16x1xf32>
    %16 = vector.broadcast %8 : vector<16x1xf32> to vector<16x32xf32>
    %17 = arith.subf %4, %16 : vector<16x32xf32>
    %cst_6 = arith.constant 9.99999996E-13 : f32
    %18 = vector.broadcast %cst_6 : f32 to vector<16x1xf32>
    %19 = arith.addf %15, %18 : vector<16x1xf32>
    %20 = math.rsqrt %19 : vector<16x1xf32>
    %21 = vector.broadcast %20 : vector<16x1xf32> to vector<16x32xf32>
    %22 = arith.mulf %17, %21 : vector<16x32xf32>
    %c0_7 = arith.constant 0 : index
    %c0_8 = arith.constant 0 : index
    %23 = vector.load %arg3[%c0_7, %c0_8] : memref<1x32xf32, #tpu.memory_space<vmem>>, vector<1x32xf32>
    %24 = vector.broadcast %23 : vector<1x32xf32> to vector<16x32xf32>
    %25 = arith.mulf %22, %24 : vector<16x32xf32>
    %c0_9 = arith.constant 0 : index
    %c0_10 = arith.constant 0 : index
    %26 = vector.load %arg4[%c0_9, %c0_10] : memref<1x32xf32, #tpu.memory_space<vmem>>, vector<1x32xf32>
    %27 = vector.broadcast %26 : vector<1x32xf32> to vector<16x32xf32>
    %28 = arith.addf %25, %27 : vector<16x32xf32>
    %29 = arith.truncf %28 : vector<16x32xf32> to vector<16x32xbf16>
    %c0_11 = arith.constant 0 : index
    %c0_12 = arith.constant 0 : index
    %30 = vector.load %arg5[%c0_11, %c0_12] : memref<16x32xbf16, #tpu.memory_space<vmem>>, vector<16x32xbf16>
    tpu.vector_store %arg5[%c0_11, %c0_12], %29 {strides = array<i32>} : memref<16x32xbf16, #tpu.memory_space<vmem>>, vector<16x32xbf16>,
    return
  }
  func.func @transform_0(%arg0: i32) -> (i32, i32) {
    %c0_i32 = arith.constant 0 : i32
    %c0_i32_0 = arith.constant 0 : i32
    return %arg0, %c0_i32 : i32, i32
  }
  func.func @transform_1(%arg0: i32) -> (i32, i32) {
    %c0_i32 = arith.constant 0 : i32
    %c0_i32_0 = arith.constant 0 : i32
    return %arg0, %c0_i32 : i32, i32
  }
  func.func @transform_2(%arg0: i32) -> (i32, i32) {
    %c0_i32 = arith.constant 0 : i32
    %c0_i32_0 = arith.constant 0 : i32
    %c0_i32_1 = arith.constant 0 : i32
    return %c0_i32, %c0_i32_0 : i32, i32
  }
  func.func @transform_3(%arg0: i32) -> (i32, i32) {
    %c0_i32 = arith.constant 0 : i32
    %c0_i32_0 = arith.constant 0 : i32
    %c0_i32_1 = arith.constant 0 : i32
    return %c0_i32, %c0_i32_0 : i32, i32
  }
  func.func @transform_4(%arg0: i32) -> (i32, i32) {
    %c0_i32 = arith.constant 0 : i32
    %c0_i32_0 = arith.constant 0 : i32
    return %arg0, %c0_i32 : i32, i32
  }
}

module attributes {stable_mosaic.version = 11 : i64} {
  func.func @_attention_kernel(%arg0: i32, %arg1: i32, %arg2: memref<1x8x32xbf16, #tpu.memory_space<vmem>>, %arg3: memref<1x8x32xbf16, #tpu.memory_space<vmem>>, %arg4: memref<1x8x32xbf16, #tpu.memory_space<vmem>>, %arg5: memref<1x8x1xf32, #tpu.memory_space<vmem>>, %arg6: memref<1x1x8xf32, #tpu.memory_space<vmem>>, %arg7: memref<1x8x32xbf16, #tpu.memory_space<vmem>>) attributes {dimension_semantics = [#tpu.dimension_semantics<parallel>, #tpu.dimension_semantics<parallel>], iteration_bounds = array<i64: 2, 1>, scalar_prefetch = 0 : i64, scratch_operands = 0 : i64, tpu.core_type = #tpu.core_type<tc>, window_params = [{transform_indices = @transform_0, window_bounds = array<i64: 1, 8, 32>}, {transform_indices = @transform_1, window_bounds = array<i64: 1, 8, 32>}, {transform_indices = @transform_2, window_bounds = array<i64: 1, 8, 32>}, {transform_indices = @transform_3, window_bounds = array<i64: 1, 8, 1>}, {transform_indices = @transform_4, window_bounds = array<i64: 1, 1, 8>}, {transform_indices = @transform_5, window_bounds = array<i64: 1, 8, 32>}]} {
    %c0 = arith.constant 0 : index
    %c0_0 = arith.constant 0 : index
    %c0_1 = arith.constant 0 : index
    %0 = vector.load %arg2[%c0, %c0_0, %c0_1] : memref<1x8x32xbf16, #tpu.memory_space<vmem>>, vector<1x8x32xbf16>
    %1 = vector.shape_cast %0 : vector<1x8x32xbf16> to vector<8x32xbf16>
    %c0_2 = arith.constant 0 : index
    %c0_3 = arith.constant 0 : index
    %c0_4 = arith.constant 0 : index
    %2 = vector.load %arg3[%c0_2, %c0_3, %c0_4] : memref<1x8x32xbf16, #tpu.memory_space<vmem>>, vector<1x8x32xbf16>
    %3 = vector.shape_cast %2 : vector<1x8x32xbf16> to vector<8x32xbf16>
    %c0_5 = arith.constant 0 : index
    %c0_6 = arith.constant 0 : index
    %c0_7 = arith.constant 0 : index
    %4 = vector.load %arg4[%c0_5, %c0_6, %c0_7] : memref<1x8x32xbf16, #tpu.memory_space<vmem>>, vector<1x8x32xbf16>
    %5 = vector.shape_cast %4 : vector<1x8x32xbf16> to vector<8x32xbf16>
    %c0_8 = arith.constant 0 : index
    %c0_9 = arith.constant 0 : index
    %c0_10 = arith.constant 0 : index
    %6 = vector.load %arg5[%c0_8, %c0_9, %c0_10] : memref<1x8x1xf32, #tpu.memory_space<vmem>>, vector<1x8x1xf32>
    %7 = vector.shape_cast %6 : vector<1x8x1xf32> to vector<8x1xf32>
    %c0_11 = arith.constant 0 : index
    %c0_12 = arith.constant 0 : index
    %c0_13 = arith.constant 0 : index
    %8 = vector.load %arg6[%c0_11, %c0_12, %c0_13] : memref<1x1x8xf32, #tpu.memory_space<vmem>>, vector<1x1x8xf32>
    %9 = vector.shape_cast %8 : vector<1x1x8xf32> to vector<1x8xf32>
    %10 = vector.broadcast %7 : vector<8x1xf32> to vector<8x8xf32>
    %11 = vector.broadcast %9 : vector<1x8xf32> to vector<8x8xf32>
    %12 = arith.mulf %10, %11 : vector<8x8xf32>
    %cst = arith.constant 5.000000e-01 : f32
    %13 = vector.broadcast %cst : f32 to vector<8x8xf32>
    %14 = arith.cmpf ogt, %12, %13 : vector<8x8xf32>
    %cst_14 = arith.constant 0.000000e+00 : f32
    %cst_15 = arith.constant -1.000000e+04 : f32
    %15 = vector.broadcast %cst_14 : f32 to vector<8x8xf32>
    %16 = vector.broadcast %cst_15 : f32 to vector<8x8xf32>
    %17 = arith.select %14, %15, %16 : vector<8x8xi1>, vector<8x8xf32>
    %18 = vector.extract_strided_slice %1 {offsets = [0, 0], sizes = [8, 8], strides = [1, 1]} : vector<8x32xbf16> to vector<8x8xbf16>
    %19 = vector.extract_strided_slice %3 {offsets = [0, 0], sizes = [8, 8], strides = [1, 1]} : vector<8x32xbf16> to vector<8x8xbf16>
    %cst_16 = arith.constant dense<0.000000e+00> : vector<8x8xf32>
    %20 = tpu.matmul %18, %19, %cst_16 {dimension_numbers = #tpu.dot_dimension_numbers<[1], [1], [0], [0], [0, 0, 1, 0], [], []>} : vector<8x8xbf16>, vector<8x8xbf16>, vector<8x8xf32> -> vector<8x8xf32>
    %21 = arith.addf %20, %17 : vector<8x8xf32>
    %cst_17 = arith.constant dense<0xFF800000> : vector<8xf32>
    %22 = vector.multi_reduction <maximumf>, %21, %cst_17 [1] : vector<8x8xf32> to vector<8xf32>
    %23 = vector.shape_cast %22 : vector<8xf32> to vector<8x1xf32>
    %24 = vector.broadcast %23 : vector<8x1xf32> to vector<8x8xf32>
    %25 = arith.subf %21, %24 : vector<8x8xf32>
    %26 = math.exp %25 : vector<8x8xf32>
    %cst_18 = arith.constant dense<0.000000e+00> : vector<8xf32>
    %27 = vector.multi_reduction <add>, %26, %cst_18 [1] : vector<8x8xf32> to vector<8xf32>
    %28 = vector.shape_cast %27 : vector<8xf32> to vector<8x1xf32>
    %29 = tpu.reciprocal %28 {approx = true} : vector<8x1xf32> -> vector<8x1xf32>
    %30 = vector.broadcast %29 : vector<8x1xf32> to vector<8x8xf32>
    %31 = arith.mulf %26, %30 : vector<8x8xf32>
    %32 = arith.truncf %31 : vector<8x8xf32> to vector<8x8xbf16>
    %33 = vector.extract_strided_slice %5 {offsets = [0, 0], sizes = [8, 8], strides = [1, 1]} : vector<8x32xbf16> to vector<8x8xbf16>
    %cst_19 = arith.constant dense<0.000000e+00> : vector<8x8xf32>
    %34 = tpu.matmul %32, %33, %cst_19 {dimension_numbers = #tpu.dot_dimension_numbers<[1], [0], [0], [1], [0, 0, 1, 1], [], []>} : vector<8x8xbf16>, vector<8x8xbf16>, vector<8x8xf32> -> vector<8x8xf32>
    %35 = arith.truncf %34 : vector<8x8xf32> to vector<8x8xbf16>
    %c0_20 = arith.constant 0 : index
    %c0_21 = arith.constant 0 : index
    %c0_22 = arith.constant 0 : index
    %36 = vector.load %arg7[%c0_20, %c0_21, %c0_22] : memref<1x8x32xbf16, #tpu.memory_space<vmem>>, vector<1x8x8xbf16>
    %37 = vector.shape_cast %36 : vector<1x8x8xbf16> to vector<8x8xbf16>
    %38 = vector.shape_cast %35 : vector<8x8xbf16> to vector<1x8x8xbf16>
    tpu.vector_store %arg7[%c0_20, %c0_21, %c0_22], %38 {strides = array<i32>} : memref<1x8x32xbf16, #tpu.memory_space<vmem>>, vector<1x8x8xbf16>,
    %39 = vector.extract_strided_slice %1 {offsets = [0, 8], sizes = [8, 8], strides = [1, 1]} : vector<8x32xbf16> to vector<8x8xbf16>
    %40 = vector.extract_strided_slice %3 {offsets = [0, 8], sizes = [8, 8], strides = [1, 1]} : vector<8x32xbf16> to vector<8x8xbf16>
    %cst_23 = arith.constant dense<0.000000e+00> : vector<8x8xf32>
    %41 = tpu.matmul %39, %40, %cst_23 {dimension_numbers = #tpu.dot_dimension_numbers<[1], [1], [0], [0], [0, 0, 1, 0], [], []>} : vector<8x8xbf16>, vector<8x8xbf16>, vector<8x8xf32> -> vector<8x8xf32>
    %42 = arith.addf %41, %17 : vector<8x8xf32>
    %cst_24 = arith.constant dense<0xFF800000> : vector<8xf32>
    %43 = vector.multi_reduction <maximumf>, %42, %cst_24 [1] : vector<8x8xf32> to vector<8xf32>
    %44 = vector.shape_cast %43 : vector<8xf32> to vector<8x1xf32>
    %45 = vector.broadcast %44 : vector<8x1xf32> to vector<8x8xf32>
    %46 = arith.subf %42, %45 : vector<8x8xf32>
    %47 = math.exp %46 : vector<8x8xf32>
    %cst_25 = arith.constant dense<0.000000e+00> : vector<8xf32>
    %48 = vector.multi_reduction <add>, %47, %cst_25 [1] : vector<8x8xf32> to vector<8xf32>
    %49 = vector.shape_cast %48 : vector<8xf32> to vector<8x1xf32>
    %50 = tpu.reciprocal %49 {approx = true} : vector<8x1xf32> -> vector<8x1xf32>
    %51 = vector.broadcast %50 : vector<8x1xf32> to vector<8x8xf32>
    %52 = arith.mulf %47, %51 : vector<8x8xf32>
    %53 = arith.truncf %52 : vector<8x8xf32> to vector<8x8xbf16>
    %54 = vector.extract_strided_slice %5 {offsets = [0, 8], sizes = [8, 8], strides = [1, 1]} : vector<8x32xbf16> to vector<8x8xbf16>
    %cst_26 = arith.constant dense<0.000000e+00> : vector<8x8xf32>
    %55 = tpu.matmul %53, %54, %cst_26 {dimension_numbers = #tpu.dot_dimension_numbers<[1], [0], [0], [1], [0, 0, 1, 1], [], []>} : vector<8x8xbf16>, vector<8x8xbf16>, vector<8x8xf32> -> vector<8x8xf32>
    %56 = arith.truncf %55 : vector<8x8xf32> to vector<8x8xbf16>
    %c0_27 = arith.constant 0 : index
    %c0_28 = arith.constant 0 : index
    %c8 = arith.constant 8 : index
    %57 = vector.load %arg7[%c0_27, %c0_28, %c8] : memref<1x8x32xbf16, #tpu.memory_space<vmem>>, vector<1x8x8xbf16>
    %58 = vector.shape_cast %57 : vector<1x8x8xbf16> to vector<8x8xbf16>
    %59 = vector.shape_cast %56 : vector<8x8xbf16> to vector<1x8x8xbf16>
    tpu.vector_store %arg7[%c0_27, %c0_28, %c8], %59 {strides = array<i32>} : memref<1x8x32xbf16, #tpu.memory_space<vmem>>, vector<1x8x8xbf16>,
    %60 = vector.extract_strided_slice %1 {offsets = [0, 16], sizes = [8, 8], strides = [1, 1]} : vector<8x32xbf16> to vector<8x8xbf16>
    %61 = vector.extract_strided_slice %3 {offsets = [0, 16], sizes = [8, 8], strides = [1, 1]} : vector<8x32xbf16> to vector<8x8xbf16>
    %cst_29 = arith.constant dense<0.000000e+00> : vector<8x8xf32>
    %62 = tpu.matmul %60, %61, %cst_29 {dimension_numbers = #tpu.dot_dimension_numbers<[1], [1], [0], [0], [0, 0, 1, 0], [], []>} : vector<8x8xbf16>, vector<8x8xbf16>, vector<8x8xf32> -> vector<8x8xf32>
    %63 = arith.addf %62, %17 : vector<8x8xf32>
    %cst_30 = arith.constant dense<0xFF800000> : vector<8xf32>
    %64 = vector.multi_reduction <maximumf>, %63, %cst_30 [1] : vector<8x8xf32> to vector<8xf32>
    %65 = vector.shape_cast %64 : vector<8xf32> to vector<8x1xf32>
    %66 = vector.broadcast %65 : vector<8x1xf32> to vector<8x8xf32>
    %67 = arith.subf %63, %66 : vector<8x8xf32>
    %68 = math.exp %67 : vector<8x8xf32>
    %cst_31 = arith.constant dense<0.000000e+00> : vector<8xf32>
    %69 = vector.multi_reduction <add>, %68, %cst_31 [1] : vector<8x8xf32> to vector<8xf32>
    %70 = vector.shape_cast %69 : vector<8xf32> to vector<8x1xf32>
    %71 = tpu.reciprocal %70 {approx = true} : vector<8x1xf32> -> vector<8x1xf32>
    %72 = vector.broadcast %71 : vector<8x1xf32> to vector<8x8xf32>
    %73 = arith.mulf %68, %72 : vector<8x8xf32>
    %74 = arith.truncf %73 : vector<8x8xf32> to vector<8x8xbf16>
    %75 = vector.extract_strided_slice %5 {offsets = [0, 16], sizes = [8, 8], strides = [1, 1]} : vector<8x32xbf16> to vector<8x8xbf16>
    %cst_32 = arith.constant dense<0.000000e+00> : vector<8x8xf32>
    %76 = tpu.matmul %74, %75, %cst_32 {dimension_numbers = #tpu.dot_dimension_numbers<[1], [0], [0], [1], [0, 0, 1, 1], [], []>} : vector<8x8xbf16>, vector<8x8xbf16>, vector<8x8xf32> -> vector<8x8xf32>
    %77 = arith.truncf %76 : vector<8x8xf32> to vector<8x8xbf16>
    %c0_33 = arith.constant 0 : index
    %c0_34 = arith.constant 0 : index
    %c16 = arith.constant 16 : index
    %78 = vector.load %arg7[%c0_33, %c0_34, %c16] : memref<1x8x32xbf16, #tpu.memory_space<vmem>>, vector<1x8x8xbf16>
    %79 = vector.shape_cast %78 : vector<1x8x8xbf16> to vector<8x8xbf16>
    %80 = vector.shape_cast %77 : vector<8x8xbf16> to vector<1x8x8xbf16>
    tpu.vector_store %arg7[%c0_33, %c0_34, %c16], %80 {strides = array<i32>} : memref<1x8x32xbf16, #tpu.memory_space<vmem>>, vector<1x8x8xbf16>,
    %81 = vector.extract_strided_slice %1 {offsets = [0, 24], sizes = [8, 8], strides = [1, 1]} : vector<8x32xbf16> to vector<8x8xbf16>
    %82 = vector.extract_strided_slice %3 {offsets = [0, 24], sizes = [8, 8], strides = [1, 1]} : vector<8x32xbf16> to vector<8x8xbf16>
    %cst_35 = arith.constant dense<0.000000e+00> : vector<8x8xf32>
    %83 = tpu.matmul %81, %82, %cst_35 {dimension_numbers = #tpu.dot_dimension_numbers<[1], [1], [0], [0], [0, 0, 1, 0], [], []>} : vector<8x8xbf16>, vector<8x8xbf16>, vector<8x8xf32> -> vector<8x8xf32>
    %84 = arith.addf %83, %17 : vector<8x8xf32>
    %cst_36 = arith.constant dense<0xFF800000> : vector<8xf32>
    %85 = vector.multi_reduction <maximumf>, %84, %cst_36 [1] : vector<8x8xf32> to vector<8xf32>
    %86 = vector.shape_cast %85 : vector<8xf32> to vector<8x1xf32>
    %87 = vector.broadcast %86 : vector<8x1xf32> to vector<8x8xf32>
    %88 = arith.subf %84, %87 : vector<8x8xf32>
    %89 = math.exp %88 : vector<8x8xf32>
    %cst_37 = arith.constant dense<0.000000e+00> : vector<8xf32>
    %90 = vector.multi_reduction <add>, %89, %cst_37 [1] : vector<8x8xf32> to vector<8xf32>
    %91 = vector.shape_cast %90 : vector<8xf32> to vector<8x1xf32>
    %92 = tpu.reciprocal %91 {approx = true} : vector<8x1xf32> -> vector<8x1xf32>
    %93 = vector.broadcast %92 : vector<8x1xf32> to vector<8x8xf32>
    %94 = arith.mulf %89, %93 : vector<8x8xf32>
    %95 = arith.truncf %94 : vector<8x8xf32> to vector<8x8xbf16>
    %96 = vector.extract_strided_slice %5 {offsets = [0, 24], sizes = [8, 8], strides = [1, 1]} : vector<8x32xbf16> to vector<8x8xbf16>
    %cst_38 = arith.constant dense<0.000000e+00> : vector<8x8xf32>
    %97 = tpu.matmul %95, %96, %cst_38 {dimension_numbers = #tpu.dot_dimension_numbers<[1], [0], [0], [1], [0, 0, 1, 1], [], []>} : vector<8x8xbf16>, vector<8x8xbf16>, vector<8x8xf32> -> vector<8x8xf32>
    %98 = arith.truncf %97 : vector<8x8xf32> to vector<8x8xbf16>
    %c0_39 = arith.constant 0 : index
    %c0_40 = arith.constant 0 : index
    %c24 = arith.constant 24 : index
    %99 = vector.load %arg7[%c0_39, %c0_40, %c24] : memref<1x8x32xbf16, #tpu.memory_space<vmem>>, vector<1x8x8xbf16>
    %100 = vector.shape_cast %99 : vector<1x8x8xbf16> to vector<8x8xbf16>
    %101 = vector.shape_cast %98 : vector<8x8xbf16> to vector<1x8x8xbf16>
    tpu.vector_store %arg7[%c0_39, %c0_40, %c24], %101 {strides = array<i32>} : memref<1x8x32xbf16, #tpu.memory_space<vmem>>, vector<1x8x8xbf16>,
    return
  }
  func.func @transform_0(%arg0: i32, %arg1: i32) -> (i32, i32, i32) {
    %c0_i32 = arith.constant 0 : i32
    %c0_i32_0 = arith.constant 0 : i32
    return %arg0, %arg1, %c0_i32 : i32, i32, i32
  }
  func.func @transform_1(%arg0: i32, %arg1: i32) -> (i32, i32, i32) {
    %c0_i32 = arith.constant 0 : i32
    %c0_i32_0 = arith.constant 0 : i32
    %c0_i32_1 = arith.constant 0 : i32
    return %arg0, %c0_i32, %c0_i32_0 : i32, i32, i32
  }
  func.func @transform_2(%arg0: i32, %arg1: i32) -> (i32, i32, i32) {
    %c0_i32 = arith.constant 0 : i32
    %c0_i32_0 = arith.constant 0 : i32
    %c0_i32_1 = arith.constant 0 : i32
    return %arg0, %c0_i32, %c0_i32_0 : i32, i32, i32
  }
  func.func @transform_3(%arg0: i32, %arg1: i32) -> (i32, i32, i32) {
    %c0_i32 = arith.constant 0 : i32
    %c0_i32_0 = arith.constant 0 : i32
    return %arg0, %arg1, %c0_i32 : i32, i32, i32
  }
  func.func @transform_4(%arg0: i32, %arg1: i32) -> (i32, i32, i32) {
    %c0_i32 = arith.constant 0 : i32
    %c0_i32_0 = arith.constant 0 : i32
    %c0_i32_1 = arith.constant 0 : i32
    return %arg0, %c0_i32, %c0_i32_0 : i32, i32, i32
  }
  func.func @transform_5(%arg0: i32, %arg1: i32) -> (i32, i32, i32) {
    %c0_i32 = arith.constant 0 : i32
    %c0_i32_0 = arith.constant 0 : i32
    return %arg0, %arg1, %c0_i32 : i32, i32, i32
  }
}

module attributes {stable_mosaic.version = 11 : i64} {
  func.func @_linear_kernel_single_k(%arg0: i32, %arg1: i32, %arg2: memref<16x32xbf16, #tpu.memory_space<vmem>>, %arg3: memref<32x128xbf16, #tpu.memory_space<vmem>>, %arg4: memref<1x128xf32, #tpu.memory_space<vmem>>, %arg5: memref<16x128xbf16, #tpu.memory_space<vmem>>) attributes {dimension_semantics = [#tpu.dimension_semantics<parallel>, #tpu.dimension_semantics<parallel>], iteration_bounds = array<i64: 1, 1>, scalar_prefetch = 0 : i64, scratch_operands = 0 : i64, tpu.core_type = #tpu.core_type<tc>, window_params = [{transform_indices = @transform_0, window_bounds = array<i64: 16, 32>}, {transform_indices = @transform_1, window_bounds = array<i64: 32, 128>}, {transform_indices = @transform_2, window_bounds = array<i64: 1, 128>}, {transform_indices = @transform_3, window_bounds = array<i64: 16, 128>}]} {
    %c0 = arith.constant 0 : index
    %c0_0 = arith.constant 0 : index
    %0 = vector.load %arg2[%c0, %c0_0] : memref<16x32xbf16, #tpu.memory_space<vmem>>, vector<16x32xbf16>
    %c0_1 = arith.constant 0 : index
    %c0_2 = arith.constant 0 : index
    %1 = vector.load %arg3[%c0_1, %c0_2] : memref<32x128xbf16, #tpu.memory_space<vmem>>, vector<32x128xbf16>
    %cst = arith.constant dense<0.000000e+00> : vector<16x128xf32>
    %2 = tpu.matmul %0, %1, %cst {dimension_numbers = #tpu.dot_dimension_numbers<[1], [0], [0], [1], [0, 0, 1, 1], [], []>} : vector<16x32xbf16>, vector<32x128xbf16>, vector<16x128xf32> -> vector<16x128xf32>
    %c0_3 = arith.constant 0 : index
    %c0_4 = arith.constant 0 : index
    %3 = vector.load %arg4[%c0_3, %c0_4] : memref<1x128xf32, #tpu.memory_space<vmem>>, vector<1x128xf32>
    %4 = vector.broadcast %3 : vector<1x128xf32> to vector<16x128xf32>
    %5 = arith.addf %2, %4 : vector<16x128xf32>
    %cst_5 = arith.constant 0.000000e+00 : f32
    %6 = vector.broadcast %cst_5 : f32 to vector<16x128xf32>
    %7 = arith.maximumf %5, %6 : vector<16x128xf32>
    %8 = arith.truncf %7 : vector<16x128xf32> to vector<16x128xbf16>
    %c0_6 = arith.constant 0 : index
    %c0_7 = arith.constant 0 : index
    %9 = vector.load %arg5[%c0_6, %c0_7] : memref<16x128xbf16, #tpu.memory_space<vmem>>, vector<16x128xbf16>
    tpu.vector_store %arg5[%c0_6, %c0_7], %8 {strides = array<i32>} : memref<16x128xbf16, #tpu.memory_space<vmem>>, vector<16x128xbf16>,
    return
  }
  func.func @transform_0(%arg0: i32, %arg1: i32) -> (i32, i32) {
    %c0_i32 = arith.constant 0 : i32
    %c0_i32_0 = arith.constant 0 : i32
    return %arg0, %c0_i32 : i32, i32
  }
  func.func @transform_1(%arg0: i32, %arg1: i32) -> (i32, i32) {
    %c0_i32 = arith.constant 0 : i32
    %c0_i32_0 = arith.constant 0 : i32
    return %c0_i32, %arg1 : i32, i32
  }
  func.func @transform_2(%arg0: i32, %arg1: i32) -> (i32, i32) {
    %c0_i32 = arith.constant 0 : i32
    %c0_i32_0 = arith.constant 0 : i32
    return %c0_i32, %arg1 : i32, i32
  }
  func.func @transform_3(%arg0: i32, %arg1: i32) -> (i32, i32) {
    %c0_i32 = arith.constant 0 : i32
    return %arg0, %arg1 : i32, i32
  }
}

module attributes {stable_mosaic.version = 11 : i64} {
  func.func @_linear_kernel_single_k(%arg0: i32, %arg1: i32, %arg2: memref<16x64xbf16, #tpu.memory_space<vmem>>, %arg3: memref<64x128xbf16, #tpu.memory_space<vmem>>, %arg4: memref<1x128xf32, #tpu.memory_space<vmem>>, %arg5: memref<16x128xbf16, #tpu.memory_space<vmem>>) attributes {dimension_semantics = [#tpu.dimension_semantics<parallel>, #tpu.dimension_semantics<parallel>], iteration_bounds = array<i64: 1, 1>, scalar_prefetch = 0 : i64, scratch_operands = 0 : i64, tpu.core_type = #tpu.core_type<tc>, window_params = [{transform_indices = @transform_0, window_bounds = array<i64: 16, 64>}, {transform_indices = @transform_1, window_bounds = array<i64: 64, 128>}, {transform_indices = @transform_2, window_bounds = array<i64: 1, 128>}, {transform_indices = @transform_3, window_bounds = array<i64: 16, 128>}]} {
    %c0 = arith.constant 0 : index
    %c0_0 = arith.constant 0 : index
    %0 = vector.load %arg2[%c0, %c0_0] : memref<16x64xbf16, #tpu.memory_space<vmem>>, vector<16x64xbf16>
    %c0_1 = arith.constant 0 : index
    %c0_2 = arith.constant 0 : index
    %1 = vector.load %arg3[%c0_1, %c0_2] : memref<64x128xbf16, #tpu.memory_space<vmem>>, vector<64x128xbf16>
    %cst = arith.constant dense<0.000000e+00> : vector<16x128xf32>
    %2 = tpu.matmul %0, %1, %cst {dimension_numbers = #tpu.dot_dimension_numbers<[1], [0], [0], [1], [0, 0, 1, 1], [], []>} : vector<16x64xbf16>, vector<64x128xbf16>, vector<16x128xf32> -> vector<16x128xf32>
    %c0_3 = arith.constant 0 : index
    %c0_4 = arith.constant 0 : index
    %3 = vector.load %arg4[%c0_3, %c0_4] : memref<1x128xf32, #tpu.memory_space<vmem>>, vector<1x128xf32>
    %4 = vector.broadcast %3 : vector<1x128xf32> to vector<16x128xf32>
    %5 = arith.addf %2, %4 : vector<16x128xf32>
    %6 = arith.truncf %5 : vector<16x128xf32> to vector<16x128xbf16>
    %c0_5 = arith.constant 0 : index
    %c0_6 = arith.constant 0 : index
    %7 = vector.load %arg5[%c0_5, %c0_6] : memref<16x128xbf16, #tpu.memory_space<vmem>>, vector<16x128xbf16>
    tpu.vector_store %arg5[%c0_5, %c0_6], %6 {strides = array<i32>} : memref<16x128xbf16, #tpu.memory_space<vmem>>, vector<16x128xbf16>,
    return
  }
  func.func @transform_0(%arg0: i32, %arg1: i32) -> (i32, i32) {
    %c0_i32 = arith.constant 0 : i32
    %c0_i32_0 = arith.constant 0 : i32
    return %arg0, %c0_i32 : i32, i32
  }
  func.func @transform_1(%arg0: i32, %arg1: i32) -> (i32, i32) {
    %c0_i32 = arith.constant 0 : i32
    %c0_i32_0 = arith.constant 0 : i32
    return %c0_i32, %arg1 : i32, i32
  }
  func.func @transform_2(%arg0: i32, %arg1: i32) -> (i32, i32) {
    %c0_i32 = arith.constant 0 : i32
    %c0_i32_0 = arith.constant 0 : i32
    return %c0_i32, %arg1 : i32, i32
  }
  func.func @transform_3(%arg0: i32, %arg1: i32) -> (i32, i32) {
    %c0_i32 = arith.constant 0 : i32
    return %arg0, %arg1 : i32, i32
  }
}

module attributes {stable_mosaic.version = 11 : i64} {
  func.func @_attention_kernel(%arg0: i32, %arg1: i32, %arg2: memref<1x8x32xbf16, #tpu.memory_space<vmem>>, %arg3: memref<1x8x32xbf16, #tpu.memory_space<vmem>>, %arg4: memref<1x8x32xbf16, #tpu.memory_space<vmem>>, %arg5: memref<1x8x1xf32, #tpu.memory_space<vmem>>, %arg6: memref<1x1x8xf32, #tpu.memory_space<vmem>>, %arg7: memref<1x8x32xbf16, #tpu.memory_space<vmem>>) attributes {dimension_semantics = [#tpu.dimension_semantics<parallel>, #tpu.dimension_semantics<parallel>], iteration_bounds = array<i64: 2, 1>, scalar_prefetch = 0 : i64, scratch_operands = 0 : i64, tpu.core_type = #tpu.core_type<tc>, window_params = [{transform_indices = @transform_0, window_bounds = array<i64: 1, 8, 32>}, {transform_indices = @transform_1, window_bounds = array<i64: 1, 8, 32>}, {transform_indices = @transform_2, window_bounds = array<i64: 1, 8, 32>}, {transform_indices = @transform_3, window_bounds = array<i64: 1, 8, 1>}, {transform_indices = @transform_4, window_bounds = array<i64: 1, 1, 8>}, {transform_indices = @transform_5, window_bounds = array<i64: 1, 8, 32>}]} {
    %c0 = arith.constant 0 : index
    %c0_0 = arith.constant 0 : index
    %c0_1 = arith.constant 0 : index
    %0 = vector.load %arg2[%c0, %c0_0, %c0_1] : memref<1x8x32xbf16, #tpu.memory_space<vmem>>, vector<1x8x32xbf16>
    %1 = vector.shape_cast %0 : vector<1x8x32xbf16> to vector<8x32xbf16>
    %c0_2 = arith.constant 0 : index
    %c0_3 = arith.constant 0 : index
    %c0_4 = arith.constant 0 : index
    %2 = vector.load %arg3[%c0_2, %c0_3, %c0_4] : memref<1x8x32xbf16, #tpu.memory_space<vmem>>, vector<1x8x32xbf16>
    %3 = vector.shape_cast %2 : vector<1x8x32xbf16> to vector<8x32xbf16>
    %c0_5 = arith.constant 0 : index
    %c0_6 = arith.constant 0 : index
    %c0_7 = arith.constant 0 : index
    %4 = vector.load %arg4[%c0_5, %c0_6, %c0_7] : memref<1x8x32xbf16, #tpu.memory_space<vmem>>, vector<1x8x32xbf16>
    %5 = vector.shape_cast %4 : vector<1x8x32xbf16> to vector<8x32xbf16>
    %c0_8 = arith.constant 0 : index
    %c0_9 = arith.constant 0 : index
    %c0_10 = arith.constant 0 : index
    %6 = vector.load %arg5[%c0_8, %c0_9, %c0_10] : memref<1x8x1xf32, #tpu.memory_space<vmem>>, vector<1x8x1xf32>
    %7 = vector.shape_cast %6 : vector<1x8x1xf32> to vector<8x1xf32>
    %c0_11 = arith.constant 0 : index
    %c0_12 = arith.constant 0 : index
    %c0_13 = arith.constant 0 : index
    %8 = vector.load %arg6[%c0_11, %c0_12, %c0_13] : memref<1x1x8xf32, #tpu.memory_space<vmem>>, vector<1x1x8xf32>
    %9 = vector.shape_cast %8 : vector<1x1x8xf32> to vector<1x8xf32>
    %10 = vector.broadcast %7 : vector<8x1xf32> to vector<8x8xf32>
    %11 = vector.broadcast %9 : vector<1x8xf32> to vector<8x8xf32>
    %12 = arith.mulf %10, %11 : vector<8x8xf32>
    %13 = tpu.iota {dimensions = array<i32: 0>} : vector<8x8xi32>
    %c8_i32 = arith.constant 8 : i32
    %14 = arith.muli %arg1, %c8_i32 : i32
    %15 = vector.broadcast %14 : i32 to vector<8x8xi32>
    %16 = arith.addi %13, %15 : vector<8x8xi32>
    %17 = tpu.iota {dimensions = array<i32: 1>} : vector<8x8xi32>
    %18 = arith.cmpi sle, %17, %16 : vector<8x8xi32>
    %19 = arith.extui %18 : vector<8x8xi1> to vector<8x8xi32>
    %20 = arith.sitofp %19 : vector<8x8xi32> to vector<8x8xf32>
    %21 = arith.mulf %12, %20 : vector<8x8xf32>
    %cst = arith.constant 5.000000e-01 : f32
    %22 = vector.broadcast %cst : f32 to vector<8x8xf32>
    %23 = arith.cmpf ogt, %21, %22 : vector<8x8xf32>
    %cst_14 = arith.constant 0.000000e+00 : f32
    %cst_15 = arith.constant -1.000000e+04 : f32
    %24 = vector.broadcast %cst_14 : f32 to vector<8x8xf32>
    %25 = vector.broadcast %cst_15 : f32 to vector<8x8xf32>
    %26 = arith.select %23, %24, %25 : vector<8x8xi1>, vector<8x8xf32>
    %27 = vector.extract_strided_slice %1 {offsets = [0, 0], sizes = [8, 8], strides = [1, 1]} : vector<8x32xbf16> to vector<8x8xbf16>
    %28 = vector.extract_strided_slice %3 {offsets = [0, 0], sizes = [8, 8], strides = [1, 1]} : vector<8x32xbf16> to vector<8x8xbf16>
    %cst_16 = arith.constant dense<0.000000e+00> : vector<8x8xf32>
    %29 = tpu.matmul %27, %28, %cst_16 {dimension_numbers = #tpu.dot_dimension_numbers<[1], [1], [0], [0], [0, 0, 1, 0], [], []>} : vector<8x8xbf16>, vector<8x8xbf16>, vector<8x8xf32> -> vector<8x8xf32>
    %30 = arith.addf %29, %26 : vector<8x8xf32>
    %cst_17 = arith.constant dense<0xFF800000> : vector<8xf32>
    %31 = vector.multi_reduction <maximumf>, %30, %cst_17 [1] : vector<8x8xf32> to vector<8xf32>
    %32 = vector.shape_cast %31 : vector<8xf32> to vector<8x1xf32>
    %33 = vector.broadcast %32 : vector<8x1xf32> to vector<8x8xf32>
    %34 = arith.subf %30, %33 : vector<8x8xf32>
    %35 = math.exp %34 : vector<8x8xf32>
    %cst_18 = arith.constant dense<0.000000e+00> : vector<8xf32>
    %36 = vector.multi_reduction <add>, %35, %cst_18 [1] : vector<8x8xf32> to vector<8xf32>
    %37 = vector.shape_cast %36 : vector<8xf32> to vector<8x1xf32>
    %38 = tpu.reciprocal %37 {approx = true} : vector<8x1xf32> -> vector<8x1xf32>
    %39 = vector.broadcast %38 : vector<8x1xf32> to vector<8x8xf32>
    %40 = arith.mulf %35, %39 : vector<8x8xf32>
    %41 = arith.truncf %40 : vector<8x8xf32> to vector<8x8xbf16>
    %42 = vector.extract_strided_slice %5 {offsets = [0, 0], sizes = [8, 8], strides = [1, 1]} : vector<8x32xbf16> to vector<8x8xbf16>
    %cst_19 = arith.constant dense<0.000000e+00> : vector<8x8xf32>
    %43 = tpu.matmul %41, %42, %cst_19 {dimension_numbers = #tpu.dot_dimension_numbers<[1], [0], [0], [1], [0, 0, 1, 1], [], []>} : vector<8x8xbf16>, vector<8x8xbf16>, vector<8x8xf32> -> vector<8x8xf32>
    %44 = arith.truncf %43 : vector<8x8xf32> to vector<8x8xbf16>
    %c0_20 = arith.constant 0 : index
    %c0_21 = arith.constant 0 : index
    %c0_22 = arith.constant 0 : index
    %45 = vector.load %arg7[%c0_20, %c0_21, %c0_22] : memref<1x8x32xbf16, #tpu.memory_space<vmem>>, vector<1x8x8xbf16>
    %46 = vector.shape_cast %45 : vector<1x8x8xbf16> to vector<8x8xbf16>
    %47 = vector.shape_cast %44 : vector<8x8xbf16> to vector<1x8x8xbf16>
    tpu.vector_store %arg7[%c0_20, %c0_21, %c0_22], %47 {strides = array<i32>} : memref<1x8x32xbf16, #tpu.memory_space<vmem>>, vector<1x8x8xbf16>,
    %48 = vector.extract_strided_slice %1 {offsets = [0, 8], sizes = [8, 8], strides = [1, 1]} : vector<8x32xbf16> to vector<8x8xbf16>
    %49 = vector.extract_strided_slice %3 {offsets = [0, 8], sizes = [8, 8], strides = [1, 1]} : vector<8x32xbf16> to vector<8x8xbf16>
    %cst_23 = arith.constant dense<0.000000e+00> : vector<8x8xf32>
    %50 = tpu.matmul %48, %49, %cst_23 {dimension_numbers = #tpu.dot_dimension_numbers<[1], [1], [0], [0], [0, 0, 1, 0], [], []>} : vector<8x8xbf16>, vector<8x8xbf16>, vector<8x8xf32> -> vector<8x8xf32>
    %51 = arith.addf %50, %26 : vector<8x8xf32>
    %cst_24 = arith.constant dense<0xFF800000> : vector<8xf32>
    %52 = vector.multi_reduction <maximumf>, %51, %cst_24 [1] : vector<8x8xf32> to vector<8xf32>
    %53 = vector.shape_cast %52 : vector<8xf32> to vector<8x1xf32>
    %54 = vector.broadcast %53 : vector<8x1xf32> to vector<8x8xf32>
    %55 = arith.subf %51, %54 : vector<8x8xf32>
    %56 = math.exp %55 : vector<8x8xf32>
    %cst_25 = arith.constant dense<0.000000e+00> : vector<8xf32>
    %57 = vector.multi_reduction <add>, %56, %cst_25 [1] : vector<8x8xf32> to vector<8xf32>
    %58 = vector.shape_cast %57 : vector<8xf32> to vector<8x1xf32>
    %59 = tpu.reciprocal %58 {approx = true} : vector<8x1xf32> -> vector<8x1xf32>
    %60 = vector.broadcast %59 : vector<8x1xf32> to vector<8x8xf32>
    %61 = arith.mulf %56, %60 : vector<8x8xf32>
    %62 = arith.truncf %61 : vector<8x8xf32> to vector<8x8xbf16>
    %63 = vector.extract_strided_slice %5 {offsets = [0, 8], sizes = [8, 8], strides = [1, 1]} : vector<8x32xbf16> to vector<8x8xbf16>
    %cst_26 = arith.constant dense<0.000000e+00> : vector<8x8xf32>
    %64 = tpu.matmul %62, %63, %cst_26 {dimension_numbers = #tpu.dot_dimension_numbers<[1], [0], [0], [1], [0, 0, 1, 1], [], []>} : vector<8x8xbf16>, vector<8x8xbf16>, vector<8x8xf32> -> vector<8x8xf32>
    %65 = arith.truncf %64 : vector<8x8xf32> to vector<8x8xbf16>
    %c0_27 = arith.constant 0 : index
    %c0_28 = arith.constant 0 : index
    %c8 = arith.constant 8 : index
    %66 = vector.load %arg7[%c0_27, %c0_28, %c8] : memref<1x8x32xbf16, #tpu.memory_space<vmem>>, vector<1x8x8xbf16>
    %67 = vector.shape_cast %66 : vector<1x8x8xbf16> to vector<8x8xbf16>
    %68 = vector.shape_cast %65 : vector<8x8xbf16> to vector<1x8x8xbf16>
    tpu.vector_store %arg7[%c0_27, %c0_28, %c8], %68 {strides = array<i32>} : memref<1x8x32xbf16, #tpu.memory_space<vmem>>, vector<1x8x8xbf16>,
    %69 = vector.extract_strided_slice %1 {offsets = [0, 16], sizes = [8, 8], strides = [1, 1]} : vector<8x32xbf16> to vector<8x8xbf16>
    %70 = vector.extract_strided_slice %3 {offsets = [0, 16], sizes = [8, 8], strides = [1, 1]} : vector<8x32xbf16> to vector<8x8xbf16>
    %cst_29 = arith.constant dense<0.000000e+00> : vector<8x8xf32>
    %71 = tpu.matmul %69, %70, %cst_29 {dimension_numbers = #tpu.dot_dimension_numbers<[1], [1], [0], [0], [0, 0, 1, 0], [], []>} : vector<8x8xbf16>, vector<8x8xbf16>, vector<8x8xf32> -> vector<8x8xf32>
    %72 = arith.addf %71, %26 : vector<8x8xf32>
    %cst_30 = arith.constant dense<0xFF800000> : vector<8xf32>
    %73 = vector.multi_reduction <maximumf>, %72, %cst_30 [1] : vector<8x8xf32> to vector<8xf32>
    %74 = vector.shape_cast %73 : vector<8xf32> to vector<8x1xf32>
    %75 = vector.broadcast %74 : vector<8x1xf32> to vector<8x8xf32>
    %76 = arith.subf %72, %75 : vector<8x8xf32>
    %77 = math.exp %76 : vector<8x8xf32>
    %cst_31 = arith.constant dense<0.000000e+00> : vector<8xf32>
    %78 = vector.multi_reduction <add>, %77, %cst_31 [1] : vector<8x8xf32> to vector<8xf32>
    %79 = vector.shape_cast %78 : vector<8xf32> to vector<8x1xf32>
    %80 = tpu.reciprocal %79 {approx = true} : vector<8x1xf32> -> vector<8x1xf32>
    %81 = vector.broadcast %80 : vector<8x1xf32> to vector<8x8xf32>
    %82 = arith.mulf %77, %81 : vector<8x8xf32>
    %83 = arith.truncf %82 : vector<8x8xf32> to vector<8x8xbf16>
    %84 = vector.extract_strided_slice %5 {offsets = [0, 16], sizes = [8, 8], strides = [1, 1]} : vector<8x32xbf16> to vector<8x8xbf16>
    %cst_32 = arith.constant dense<0.000000e+00> : vector<8x8xf32>
    %85 = tpu.matmul %83, %84, %cst_32 {dimension_numbers = #tpu.dot_dimension_numbers<[1], [0], [0], [1], [0, 0, 1, 1], [], []>} : vector<8x8xbf16>, vector<8x8xbf16>, vector<8x8xf32> -> vector<8x8xf32>
    %86 = arith.truncf %85 : vector<8x8xf32> to vector<8x8xbf16>
    %c0_33 = arith.constant 0 : index
    %c0_34 = arith.constant 0 : index
    %c16 = arith.constant 16 : index
    %87 = vector.load %arg7[%c0_33, %c0_34, %c16] : memref<1x8x32xbf16, #tpu.memory_space<vmem>>, vector<1x8x8xbf16>
    %88 = vector.shape_cast %87 : vector<1x8x8xbf16> to vector<8x8xbf16>
    %89 = vector.shape_cast %86 : vector<8x8xbf16> to vector<1x8x8xbf16>
    tpu.vector_store %arg7[%c0_33, %c0_34, %c16], %89 {strides = array<i32>} : memref<1x8x32xbf16, #tpu.memory_space<vmem>>, vector<1x8x8xbf16>,
    %90 = vector.extract_strided_slice %1 {offsets = [0, 24], sizes = [8, 8], strides = [1, 1]} : vector<8x32xbf16> to vector<8x8xbf16>
    %91 = vector.extract_strided_slice %3 {offsets = [0, 24], sizes = [8, 8], strides = [1, 1]} : vector<8x32xbf16> to vector<8x8xbf16>
    %cst_35 = arith.constant dense<0.000000e+00> : vector<8x8xf32>
    %92 = tpu.matmul %90, %91, %cst_35 {dimension_numbers = #tpu.dot_dimension_numbers<[1], [1], [0], [0], [0, 0, 1, 0], [], []>} : vector<8x8xbf16>, vector<8x8xbf16>, vector<8x8xf32> -> vector<8x8xf32>
    %93 = arith.addf %92, %26 : vector<8x8xf32>
    %cst_36 = arith.constant dense<0xFF800000> : vector<8xf32>
    %94 = vector.multi_reduction <maximumf>, %93, %cst_36 [1] : vector<8x8xf32> to vector<8xf32>
    %95 = vector.shape_cast %94 : vector<8xf32> to vector<8x1xf32>
    %96 = vector.broadcast %95 : vector<8x1xf32> to vector<8x8xf32>
    %97 = arith.subf %93, %96 : vector<8x8xf32>
    %98 = math.exp %97 : vector<8x8xf32>
    %cst_37 = arith.constant dense<0.000000e+00> : vector<8xf32>
    %99 = vector.multi_reduction <add>, %98, %cst_37 [1] : vector<8x8xf32> to vector<8xf32>
    %100 = vector.shape_cast %99 : vector<8xf32> to vector<8x1xf32>
    %101 = tpu.reciprocal %100 {approx = true} : vector<8x1xf32> -> vector<8x1xf32>
    %102 = vector.broadcast %101 : vector<8x1xf32> to vector<8x8xf32>
    %103 = arith.mulf %98, %102 : vector<8x8xf32>
    %104 = arith.truncf %103 : vector<8x8xf32> to vector<8x8xbf16>
    %105 = vector.extract_strided_slice %5 {offsets = [0, 24], sizes = [8, 8], strides = [1, 1]} : vector<8x32xbf16> to vector<8x8xbf16>
    %cst_38 = arith.constant dense<0.000000e+00> : vector<8x8xf32>
    %106 = tpu.matmul %104, %105, %cst_38 {dimension_numbers = #tpu.dot_dimension_numbers<[1], [0], [0], [1], [0, 0, 1, 1], [], []>} : vector<8x8xbf16>, vector<8x8xbf16>, vector<8x8xf32> -> vector<8x8xf32>
    %107 = arith.truncf %106 : vector<8x8xf32> to vector<8x8xbf16>
    %c0_39 = arith.constant 0 : index
    %c0_40 = arith.constant 0 : index
    %c24 = arith.constant 24 : index
    %108 = vector.load %arg7[%c0_39, %c0_40, %c24] : memref<1x8x32xbf16, #tpu.memory_space<vmem>>, vector<1x8x8xbf16>
    %109 = vector.shape_cast %108 : vector<1x8x8xbf16> to vector<8x8xbf16>
    %110 = vector.shape_cast %107 : vector<8x8xbf16> to vector<1x8x8xbf16>
    tpu.vector_store %arg7[%c0_39, %c0_40, %c24], %110 {strides = array<i32>} : memref<1x8x32xbf16, #tpu.memory_space<vmem>>, vector<1x8x8xbf16>,
    return
  }
  func.func @transform_0(%arg0: i32, %arg1: i32) -> (i32, i32, i32) {
    %c0_i32 = arith.constant 0 : i32
    %c0_i32_0 = arith.constant 0 : i32
    return %arg0, %arg1, %c0_i32 : i32, i32, i32
  }
  func.func @transform_1(%arg0: i32, %arg1: i32) -> (i32, i32, i32) {
    %c0_i32 = arith.constant 0 : i32
    %c0_i32_0 = arith.constant 0 : i32
    %c0_i32_1 = arith.constant 0 : i32
    return %arg0, %c0_i32, %c0_i32_0 : i32, i32, i32
  }
  func.func @transform_2(%arg0: i32, %arg1: i32) -> (i32, i32, i32) {
    %c0_i32 = arith.constant 0 : i32
    %c0_i32_0 = arith.constant 0 : i32
    %c0_i32_1 = arith.constant 0 : i32
    return %arg0, %c0_i32, %c0_i32_0 : i32, i32, i32
  }
  func.func @transform_3(%arg0: i32, %arg1: i32) -> (i32, i32, i32) {
    %c0_i32 = arith.constant 0 : i32
    %c0_i32_0 = arith.constant 0 : i32
    return %arg0, %arg1, %c0_i32 : i32, i32, i32
  }
  func.func @transform_4(%arg0: i32, %arg1: i32) -> (i32, i32, i32) {
    %c0_i32 = arith.constant 0 : i32
    %c0_i32_0 = arith.constant 0 : i32
    %c0_i32_1 = arith.constant 0 : i32
    return %arg0, %c0_i32, %c0_i32_0 : i32, i32, i32
  }
  func.func @transform_5(%arg0: i32, %arg1: i32) -> (i32, i32, i32) {
    %c0_i32 = arith.constant 0 : i32
    %c0_i32_0 = arith.constant 0 : i32
    return %arg0, %arg1, %c0_i32 : i32, i32, i32
  }
}

module attributes {stable_mosaic.version = 11 : i64} {
  func.func @_linear_kernel_single_k(%arg0: i32, %arg1: i32, %arg2: memref<16x32xbf16, #tpu.memory_space<vmem>>, %arg3: memref<32x128xbf16, #tpu.memory_space<vmem>>, %arg4: memref<1x128xf32, #tpu.memory_space<vmem>>, %arg5: memref<16x128xf32, #tpu.memory_space<vmem>>) attributes {dimension_semantics = [#tpu.dimension_semantics<parallel>, #tpu.dimension_semantics<parallel>], iteration_bounds = array<i64: 1, 1>, scalar_prefetch = 0 : i64, scratch_operands = 0 : i64, tpu.core_type = #tpu.core_type<tc>, window_params = [{transform_indices = @transform_0, window_bounds = array<i64: 16, 32>}, {transform_indices = @transform_1, window_bounds = array<i64: 32, 128>}, {transform_indices = @transform_2, window_bounds = array<i64: 1, 128>}, {transform_indices = @transform_3, window_bounds = array<i64: 16, 128>}]} {
    %c0 = arith.constant 0 : index
    %c0_0 = arith.constant 0 : index
    %0 = vector.load %arg2[%c0, %c0_0] : memref<16x32xbf16, #tpu.memory_space<vmem>>, vector<16x32xbf16>
    %c0_1 = arith.constant 0 : index
    %c0_2 = arith.constant 0 : index
    %1 = vector.load %arg3[%c0_1, %c0_2] : memref<32x128xbf16, #tpu.memory_space<vmem>>, vector<32x128xbf16>
    %cst = arith.constant dense<0.000000e+00> : vector<16x128xf32>
    %2 = tpu.matmul %0, %1, %cst {dimension_numbers = #tpu.dot_dimension_numbers<[1], [0], [0], [1], [0, 0, 1, 1], [], []>} : vector<16x32xbf16>, vector<32x128xbf16>, vector<16x128xf32> -> vector<16x128xf32>
    %c0_3 = arith.constant 0 : index
    %c0_4 = arith.constant 0 : index
    %3 = vector.load %arg4[%c0_3, %c0_4] : memref<1x128xf32, #tpu.memory_space<vmem>>, vector<1x128xf32>
    %4 = vector.broadcast %3 : vector<1x128xf32> to vector<16x128xf32>
    %5 = arith.addf %2, %4 : vector<16x128xf32>
    %c0_5 = arith.constant 0 : index
    %c0_6 = arith.constant 0 : index
    %6 = vector.load %arg5[%c0_5, %c0_6] : memref<16x128xf32, #tpu.memory_space<vmem>>, vector<16x128xf32>
    tpu.vector_store %arg5[%c0_5, %c0_6], %5 {strides = array<i32>} : memref<16x128xf32, #tpu.memory_space<vmem>>, vector<16x128xf32>,
    return
  }
  func.func @transform_0(%arg0: i32, %arg1: i32) -> (i32, i32) {
    %c0_i32 = arith.constant 0 : i32
    %c0_i32_0 = arith.constant 0 : i32
    return %arg0, %c0_i32 : i32, i32
  }
  func.func @transform_1(%arg0: i32, %arg1: i32) -> (i32, i32) {
    %c0_i32 = arith.constant 0 : i32
    %c0_i32_0 = arith.constant 0 : i32
    return %c0_i32, %arg1 : i32, i32
  }
  func.func @transform_2(%arg0: i32, %arg1: i32) -> (i32, i32) {
    %c0_i32 = arith.constant 0 : i32
    %c0_i32_0 = arith.constant 0 : i32
    return %c0_i32, %arg1 : i32, i32
  }
  func.func @transform_3(%arg0: i32, %arg1: i32) -> (i32, i32) {
    %c0_i32 = arith.constant 0 : i32
    return %arg0, %arg1 : i32, i32
  }
}

</mosaic_0001>

<bundles_post_ra>
// kernel: transformer_forward.39
= control target key start
LH: loop header
LB: loop body
LE: loop exit
PB: predicated region body
PF: predicated region fallthrough
CT: control target
= control target key end

     0   :  { %v134_v0 = vmov 0.0   ;;  %vm135_vm0 = vmmov 0   ;;  %vm45_vm1 = vcmask 261120   ;;  %s171_s1 = inlined_call_operand.vmem [shape: bf16[32,128], index: 1, kind: input, shape index: {}]   ;;  %s172_s0 = inlined_call_operand.vmem [shape: bf16[16,32], index: 0, kind: input, shape index: {}]   ;;  %s173_s2 = inlined_call_operand.vmem [shape: f32[1,128], index: 2, kind: input, shape index: {}]   ;;  %s174_s3 = inlined_call_operand.vmem [shape: bf16[16,128], index: 3, kind: output, shape index: {}]  }
   0x1   :  { %121 = vmatprep.subr.bf16.mxu0 %v134_v0  ;;  %v131_v1 = vld [vmem:[%s171_s1] sm:$0xff]   ;;  %125 = vmatprep.mubr.msk.bf16.mxu0 %vm135_vm0, %v134_v0  ;;  %v132_v2 = vld [vmem:[%s171_s1 + $0x8] sm:$0xff]  }
   0x2   :  { %122 = vmatpush3.bf16.msra.mxu0 %v131_v1  ;;  %v133_v3 = vld [vmem:[%s172_s0] sm:$0xff]  }
   0x3   :  { %123 = vmatprep.subr.bf16.mxu0 %v134_v0  ;;  %v104_v4 = vld [vmem:[%s173_s2] ss:$0 sm:$0xff] }
   0x6   :  { %124 = vmatpush3.bf16.msra.mxu0 %v132_v2 }
   0x9   :  { %126 = vmatmul.mubr.msk.bf16.vlgmr.msra.gmra.mrb[0].mxu0 %vm45_vm1, %v133_v3 }
  0xdc   :  { %v83_v5 = vpop.f32.mrb[0].mxu0 }
  0xdd   :  { %v127_v6 = vpop.f32.mrb[1].mxu0  ;;  %v84_v8 = vadd.f32 %v104_v4, %v83_v5 }
  0xde   :  { %v86_v7 = vpop.f32.mrb[2].mxu0 }
  0xdf   :  { %v87_v9 = vadd.f32 %v104_v4, %v86_v7  ;;  %v128_v10 = vpop.f32.mrb[3].mxu0 }
  0xe1   :  { %v116_v11 = vpack.c.bf16 %v87_v9, %v84_v8 }
  0xe3   :  { %117 = vst [vmem:[%s174_s3] sm:$0xff] %v116_v11  }

// kernel: transformer_forward.42
= control target key start
LH: loop header
LB: loop body
LE: loop exit
PB: predicated region body
PF: predicated region fallthrough
CT: control target
= control target key end

     0   :  { %vm27_vm0 = vcmask 261120   ;;  %vm81_vm1 = vcmask 257024   ;;  %s153_s0 = inlined_call_operand.vmem [shape: bf16[16,32], index: 0, kind: input, shape index: {}]   ;;  %s154_s1 = inlined_call_operand.vmem [shape: bf16[16,32], index: 1, kind: input, shape index: {}]   ;;  %s155_s2 = inlined_call_operand.vmem [shape: f32[1,32], index: 2, kind: input, shape index: {}]   ;;  %s156_s3 = inlined_call_operand.vmem [shape: f32[1,32], index: 3, kind: input, shape index: {}]   ;;  %s157_s4 = inlined_call_operand.vmem [shape: bf16[16,32], index: 4, kind: output, shape index: {}]  }
   0x1   :  { %v95_v0 = vld [vmem:[%s153_s0] sm:$0xff]  }
   0x2   :  { %v99_v1 = vld [vmem:[%s154_s1] sm:$0xff]   ;;  %v96_v2 = vunpack.c.l.bf16 %v95_v0  ;;  %v97_v4 = vunpack.c.h.bf16 %v95_v0 }
   0x3   :  { %v100_v3 = vunpack.c.l.bf16 %v99_v1  ;;  %v101_v5 = vunpack.c.h.bf16 %v99_v1  ;;  %v88_v27 = vld [vmem:[%s155_s2] ss:$0 sm:$0xff] }
   0x4   :  { %v89_v29 = vld [vmem:[%s156_s3] ss:$0 sm:$0xff] }
   0x5   :  { %v25_v6 = vadd.f32 %v100_v3, %v96_v2  ;;  %v26_v7 = vadd.f32 %v101_v5, %v97_v4 }
   0x7   :  { %v28_v8 = vsel %vm27_vm0, %v25_v6, 0.0  ;;  %v31_v9 = vsel %vm27_vm0, %v26_v7, 0.0 }
   0x8   :  { %29 = vadd.xlane.f32.xlu0 %v28_v8 }
   0xc   :  { %32 = vadd.xlane.f32.xlu0 %v31_v9 }
  0x95   :  { %v30_v10 = vpop.xlane.xlu0 %29 }
  0x96   :  { %v35_v11 = vmul.f32 0.03125, %v30_v10 }
  0x98   :  { %v37_v12 = vsub.f32 %v25_v6, %v35_v11 }
  0x99   :  { %v33_v13 = vpop.xlane.xlu0 %32 }
  0x9a   :  { %v36_v14 = vmul.f32 0.03125, %v33_v13  ;;  %v39_v15 = vmul.f32 %v37_v12, %v37_v12 }
  0x9c   :  { %v38_v16 = vsub.f32 %v26_v7, %v36_v14  ;;  %v41_v17 = vsel %vm27_vm0, %v39_v15, 0.0 }
  0x9d   :  { %42 = vadd.xlane.f32.xlu1 %v41_v17 }
  0x9e   :  { %v40_v18 = vmul.f32 %v38_v16, %v38_v16 }
  0xa0   :  { %v44_v19 = vsel %vm27_vm0, %v40_v18, 0.0 }
  0xa1   :  { %45 = vadd.xlane.f32.xlu1 %v44_v19 }
 0x12a   :  { %v43_v20 = vpop.xlane.xlu1 %42 }
 0x12b   :  { %v47_v21 = vmul.f32 0.03125, %v43_v20 }
 0x12d   :  { %v49_v22 = vadd.f32 1e-12, %v47_v21 }
 0x12e   :  { %v46_v23 = vpop.xlane.xlu1 %45 }
 0x12f   :  { %102 = vrsqrt.f32 %v49_v22  ;;  %v48_v24 = vmul.f32 0.03125, %v46_v23 }
 0x131   :  { %v50_v25 = vadd.f32 1e-12, %v48_v24 }
 0x133   :  { %104 = vrsqrt.f32 %v50_v25 }
 0x139   :  { %v103_v26 = vpop.eup %102 }
 0x13a   :  { %v53_v28 = vmul.f32 %v103_v26, %v37_v12 }
 0x13c   :  { %v62_v30 = vmul.f32 %v88_v27, %v53_v28 }
 0x13d   :  { %v105_v31 = vpop.eup %104 }
 0x13e   :  { %v71_v32 = vadd.f32 %v89_v29, %v62_v30  ;;  %v54_v33 = vmul.f32 %v105_v31, %v38_v16 }
 0x140   :  { %v92_v34 = vpack.c.bf16 %v71_v32, %v71_v32  ;;  %v63_v35 = vmul.f32 %v88_v27, %v54_v33 }
 0x142   :  { %82 = vst.msk [vmem:[%s157_s4] sm:$0xf] %vm81_vm1, %v92_v34  ;;  %v72_v36 = vadd.f32 %v89_v29, %v63_v35 }
 0x144   :  { %v93_v37 = vpack.c.bf16 %v72_v36, %v72_v36 }
 0x146   :  { %83 = vst.msk [vmem:[%s157_s4 + $0x4] sm:$0xf] %vm81_vm1, %v93_v37 }

// kernel: transformer_forward.43
= control target key start
LH: loop header
LB: loop body
LE: loop exit
PB: predicated region body
PF: predicated region fallthrough
CT: control target
= control target key end

     0   :  { %v136_v0 = vmov 0.0   ;;  %vm137_vm0 = vmmov 0   ;;  %vm45_vm1 = vcmask 261120   ;;  %s173_s1 = inlined_call_operand.vmem [shape: bf16[32,128], index: 1, kind: input, shape index: {}]   ;;  %s174_s0 = inlined_call_operand.vmem [shape: bf16[16,32], index: 0, kind: input, shape index: {}]   ;;  %s175_s2 = inlined_call_operand.vmem [shape: f32[1,128], index: 2, kind: input, shape index: {}]   ;;  %s176_s3 = inlined_call_operand.vmem [shape: bf16[16,128], index: 3, kind: output, shape index: {}]  }
   0x1   :  { %123 = vmatprep.subr.bf16.mxu0 %v136_v0  ;;  %v133_v1 = vld [vmem:[%s173_s1] sm:$0xff]   ;;  %127 = vmatprep.mubr.msk.bf16.mxu0 %vm137_vm0, %v136_v0  ;;  %v134_v2 = vld [vmem:[%s173_s1 + $0x8] sm:$0xff]  }
   0x2   :  { %124 = vmatpush3.bf16.msra.mxu0 %v133_v1  ;;  %v135_v3 = vld [vmem:[%s174_s0] sm:$0xff]  }
   0x3   :  { %125 = vmatprep.subr.bf16.mxu0 %v136_v0  ;;  %v106_v4 = vld [vmem:[%s175_s2] ss:$0 sm:$0xff] }
   0x6   :  { %126 = vmatpush3.bf16.msra.mxu0 %v134_v2 }
   0x9   :  { %128 = vmatmul.mubr.msk.bf16.vlgmr.msra.gmra.mrb[0].mxu0 %vm45_vm1, %v135_v3 }
  0xdc   :  { %v83_v5 = vpop.f32.mrb[0].mxu0 }
  0xdd   :  { %v84_v6 = vadd.f32 %v106_v4, %v83_v5  ;;  %v129_v7 = vpop.f32.mrb[1].mxu0 }
  0xde   :  { %v86_v8 = vpop.f32.mrb[2].mxu0 }
  0xdf   :  { %v87_v9 = vadd.f32 %v106_v4, %v86_v8  ;;  %v130_v10 = vpop.f32.mrb[3].mxu0  ;;  %v90_v11 = vmax.f32 %v84_v6, 0.0 }
  0xe1   :  { %v91_v12 = vmax.f32 %v87_v9, 0.0 }
  0xe3   :  { %v118_v13 = vpack.c.bf16 %v91_v12, %v90_v11 }
  0xe5   :  { %119 = vst [vmem:[%s176_s3] sm:$0xff] %v118_v13  }

// kernel: transformer_forward.40
= control target key start
LH: loop header
LB: loop body
LE: loop exit
PB: predicated region body
PF: predicated region fallthrough
CT: control target
= control target key end

     0   :  { %s1156_s18 = smov 0   ;;  %s1158_s19 = smov 0   ;;  %s1281_s0 = inlined_call_operand.vmem [shape: bf16[2,8,32], index: 0, kind: input, shape index: {}]   ;;  %s1282_s1 = inlined_call_operand.vmem [shape: bf16[2,8,32], index: 1, kind: input, shape index: {}]   ;;  %s1283_s2 = inlined_call_operand.vmem [shape: bf16[2,8,32], index: 2, kind: input, shape index: {}]   ;;  %s1284_s3 = inlined_call_operand.vmem [shape: f32[2,8,1], index: 3, kind: input, shape index: {}]   ;;  %s1285_s4 = inlined_call_operand.vmem [shape: f32[2,1,8], index: 4, kind: input, shape index: {}]   ;;  %s1286_s5 = inlined_call_operand.vmem [shape: bf16[2,8,32], index: 5, kind: output, shape index: {}]  }
   0x1   :  { %s1160_s20 = smov 0  }
   0x2 LB: > { %s27_s21 = sadd.s32 1, %s1110_s19  ;;  %p948_p0 = scmp.ge.s32.totalorder %s1114_s20, 1  ;;  %s1114_s20 = sphi %s1160_s20, %s15_s20   ;;  %s1110_s19 = sphi %s1158_s19, %s1288_s19   ;;  %s1106_s18 = sphi %s1156_s18, %s1287_s18  }
   0x3   : > { %p29_p1 = scmp.ge.s32.totalorder %s27_s21, 2  ;;  %p245_p2 = scmp.lt.s32.totalorder %s1114_s20, 3 }
   0x5   : > { %s1290_s21 = smov (%p29_p1, %s27_s21), 0  ;;  %p246_p3 = pnand %p948_p0, %p245_p2 }
   0x6   : > { %p295_p4 = scmp.lt.s32.totalorder (!%p246_p3), %s1106_s18, 1  ;;  %v1116_v0 = vmov (!%p246_p3), 0.0   ;;  %vm1117_vm0 = vmmov (!%p246_p3), 0   ;;  %v1118_v1 = vmov (!%p246_p3), 0   ;;  %vm347_vm1 = vcmask (!%p246_p3), 64512   ;;  %s1119_s8 = smov (!%p246_p3), 120  }
   0x7   : > { %249 = sbr.rel (%p246_p3) target bundleno = 1440 (0x5a0), region = 40  ;;  %990 = vmatprep.subr.bf16.mxu0 (!%p246_p3), %v1116_v0  ;;  %992 = vmatprep.mubr.msk.bf16.mxu0 (!%p246_p3), %vm1117_vm0, %v1116_v0  ;;  %v1120_v10 = vmov (!%p246_p3), -10000.0   ;;  %s1121_s12 = smov (!%p246_p3), 104   ;;  %vm409_vm3 = vcmask (!%p246_p3), 1043456   ;;  %vm454_vm4 = vcmask (!%p246_p3), 60416   ;;  %vm582_vm5 = vcmask (!%p246_p3), 126016  }
   0x8   : > { %1072 = vset.pattern.permute.xlu0 (!%p246_p3), %v1118_v1  ;;  %996 = vmatprep.subr.bf16.mxu1 (!%p246_p3), %v1116_v0  ;;  %s1122_s16 = smov (!%p246_p3), 112   ;;  %s1124_s24 = smov (!%p246_p3), 16   ;;  %vm701_vm6 = vcmask (!%p246_p3), 191616   ;;  %vm820_vm7 = vcmask (!%p246_p3), 257216  }
   0x9   : > { %998 = vmatprep.mubr.msk.bf16.mxu1 (!%p246_p3), %vm1117_vm0, %v1116_v0  ;;  %s1125_s25 = smov (!%p246_p3), 24  }
   0xe   : > { %s1292_s18 = smov (!%p295_p4, %s1106_s18), 1 }
   0xf   : > { %s1180_s22 = sshll.u32 %s1292_s18, 2  ;;  %s952_s23 = sshll.u32 %s1292_s18, 3 }
  0x10   : > { %s305_s26 = scalar_lea.vmem %s1282_s1, %s1180_s22  ;;  %s316_s29 = scalar_lea.vmem %s1284_s3, %s952_s23 }
  0x11   : > { %v329_v2 = vld [vmem:[%s305_s26] sm:$0xf]  ;;  %s301_s7 = scalar_lea.vmem %s1281_s0, %s1180_s22  ;;  %s319_s11 = scalar_lea.vmem %s1285_s4, %s1292_s18 }
  0x12   : > { %v352_v3 = vsel %vm347_vm1, %v329_v2, 0  ;;  %v331_v4 = vld [vmem:[%s316_s29] sm:$0xff]  ;;  %v958_v6 = vcombine.low %v329_v2, %v329_v2  ;;  %s309_s15 = scalar_lea.vmem %s1283_s2, %s1180_s22  ;;  %s1240_s23 = scalar_lea.vmem %s1286_s5, %s1180_s22 }
  0x13   : > { %991 = vmatpush3.bf16.xpose.msra.mxu0 %v352_v3  ;;  %335 = vperm.xlu0 %1072, %v331_v4   ;;  %v328_v5 = vld [vmem:[%s301_s7] sm:$0xf]  ;;  %s1123_s22 = smov 8  }
  0x14   : > { %1008 = vmatprep.subr.bf16.mxu0 %v1116_v0  ;;  %464 = vrot.lane.b32.xlu1 %v958_v6, %s1119_s8  ;;  %v954_v7 = vld [vmem:[%s319_s11] ss:$0 sm:$0xff]  ;;  %v957_v18 = vcombine.low %v328_v5, %v328_v5 }
  0x15   : > { %v1212_v24 = vld [vmem:[%s309_s15] sm:$0xf] }
  0x16   : > { %v411_v25 = vsel %vm409_vm3, %v1212_v24, 0  ;;  %v960_v62 = vcombine.low %v1212_v24, %v1212_v24 }
  0x17   : > { %997 = vmatpush3.bf16.msra.mxu1 %v411_v25 }
  0x18   : > { %1002 = vmatprep.subr.bf16.mxu1 %v1116_v0 }
  0x1a   : > { %993 = vmatmul.mubr.msk.bf16.vlgmr.msra.gmra.mrb[0].mxu0 %vm347_vm1, %v328_v5 }
  0x1b   : > { %1010 = vmatprep.mubr.msk.bf16.mxu0 %vm1117_vm0, %v1116_v0 }
  0x86   : > { %v465_v26 = vpop.permute.xlu1 %464 }
  0x87   : > { %v470_v33 = vsel %vm347_vm1, %v465_v26, 0 }
  0x92   : > { %v336_v8 = vpop.permute.xlu0 %335 }
  0x93   : > { %v344_v9 = vmul.f32 %v954_v7, %v336_v8 }
  0x95   : > { %vm345_vm2 = vcmp.gt.f32.partialorder %v344_v9, 0.5 }
  0x96   : > { %v1202_v11 = vsel %vm345_vm2, 0.0, %v1120_v10 }
  0xed   : > { %v388_v12 = vpop.f32.mrb[0].mxu0 }
  0xee   : > { %v389_v13 = vadd.f32 %v388_v12, %v1202_v11  ;;  %v994_v14 = vpop.f32.mrb[1].mxu0 }
  0xef   : > { %v391_v15 = vpop.f32.mrb[2].mxu0 }
  0xf0   : > { %v995_v16 = vpop.f32.mrb[3].mxu0  ;;  %v394_v17 = vsel %vm347_vm1, %v389_v13, -inf }
  0xf1   : > { %395 = vmax.xlane.f32.xlu0 %v394_v17 }
 0x107   : > { %703 = vrot.lane.b32.xlu0 %v957_v18, %s1121_s12 }
 0x17e   : > { %v396_v19 = vpop.xlane.xlu0 %395 }
 0x17f   : > { %v397_v20 = vsub.f32 %v389_v13, %v396_v19 }
 0x181   : > { %v398_v21 = vmul.f32 1.442695, %v397_v20 }
 0x182   : > { %v704_v38 = vpop.permute.xlu0 %703 }
 0x183   : > { %1076 = vpow2.f32 %v398_v21 }
 0x18d   : > { %v1077_v22 = vpop.eup %1076 }
 0x18e   : > { %v400_v23 = vsel %vm347_vm1, %v1077_v22, 0.0 }
 0x18f   : > { %401 = vadd.xlane.f32.xlu1 %v400_v23 }
 0x1a0   : > { %459 = vrot.lane.b32.xlu1 %v957_v18, %s1119_s8 }
 0x1a4   : > { %586 = vrot.lane.b32.xlu1 %v958_v6, %s1122_s16 }
 0x1a8   : > { %584 = vrot.lane.b32.xlu1 %v957_v18, %s1122_s16 }
 0x1ac   : > { %705 = vrot.lane.b32.xlu1 %v958_v6, %s1121_s12 }
 0x21c   : > { %v402_v27 = vpop.xlane.xlu1 %401 }
 0x21d   : > { %1078 = vrcp.f32 %v402_v27 }
 0x220   : > { %v460_v28 = vpop.permute.xlu1 %459 }
 0x224   : > { %v587_v32 = vpop.permute.xlu1 %586 }
 0x225   : > { %v592_v35 = vsel %vm347_vm1, %v587_v32, 0 }
 0x227   : > { %v1079_v29 = vpop.eup %1078 }
 0x228   : > { %v404_v30 = vmul.f32 %v1079_v29, %v1077_v22  ;;  %v585_v34 = vpop.permute.xlu1 %584 }
 0x22a   : > { %v405_v31 = vpack.c.bf16 %v404_v30, %v404_v30 }
 0x22c   : > { %999 = vmatmul.mubr.msk.bf16.vlgmr.msra.gmra.mrb[0].mxu1 %vm347_vm1, %v405_v31  ;;  %v706_v36 = vpop.permute.xlu1 %705 }
 0x22d   : > { %1003 = vmatpush3.bf16.xpose.msra.mxu1 %v470_v33  ;;  %1004 = vmatprep.mubr.msk.bf16.mxu1 %vm1117_vm0, %v1116_v0  ;;  %v711_v37 = vsel %vm347_vm1, %v706_v36, 0 }
 0x22e   : > { %1014 = vmatprep.subr.bf16.mxu1 %v1116_v0 }
 0x234   : > { %1005 = vmatmul.mubr.msk.bf16.vlgmr.msra.gmra.mrb[4].mxu1 %vm347_vm1, %v460_v28 }
 0x235   : > { %1015 = vmatpush3.bf16.xpose.msra.mxu1 %v592_v35  ;;  %1016 = vmatprep.mubr.msk.bf16.mxu1 %vm1117_vm0, %v1116_v0 }
 0x236   : > { %1026 = vmatprep.subr.bf16.mxu1 %v1116_v0 }
 0x23c   : > { %1017 = vmatmul.mubr.msk.bf16.vlgmr.msra.gmra.mrb[8].mxu1 %vm347_vm1, %v585_v34 }
 0x23d   : > { %1027 = vmatpush3.bf16.xpose.msra.mxu1 %v711_v37  ;;  %1028 = vmatprep.mubr.msk.bf16.mxu1 %vm1117_vm0, %v1116_v0 }
 0x244   : > { %1029 = vmatmul.mubr.msk.bf16.vlgmr.msra.gmra.mrb[12].mxu1 %vm347_vm1, %v704_v38 }
 0x2ff   : > { %v447_v39 = vpop.f32.mrb[0].mxu1 }
 0x300   : > { %v453_v40 = vpack.c.bf16 %v447_v39, %v447_v39  ;;  %v1000_v41 = vpop.f32.mrb[1].mxu1 }
 0x301   : > { %v450_v42 = vpop.f32.mrb[2].mxu1 }
 0x302   : > { %455 = vst.msk [vmem:[%s1240_s23] sm:$0xf] %vm454_vm4, %v453_v40  ;;  %v1001_v43 = vpop.f32.mrb[3].mxu1 }
 0x307   : > { %v506_v44 = vpop.f32.mrb[4].mxu1 }
 0x308   : > { %v507_v45 = vadd.f32 %v506_v44, %v1202_v11  ;;  %v1006_v46 = vpop.f32.mrb[5].mxu1 }
 0x309   : > { %v509_v47 = vpop.f32.mrb[6].mxu1 }
 0x30a   : > { %v1007_v48 = vpop.f32.mrb[7].mxu1  ;;  %v512_v49 = vsel %vm347_vm1, %v507_v45, -inf }
 0x30b   : > { %513 = vmax.xlane.f32.xlu1 %v512_v49 }
 0x30f   : > { %v628_v50 = vpop.f32.mrb[8].mxu1 }
 0x310   : > { %v629_v51 = vadd.f32 %v628_v50, %v1202_v11  ;;  %v1018_v52 = vpop.f32.mrb[9].mxu1 }
 0x311   : > { %v631_v53 = vpop.f32.mrb[10].mxu1 }
 0x312   : > { %v1019_v54 = vpop.f32.mrb[11].mxu1  ;;  %v634_v55 = vsel %vm347_vm1, %v629_v51, -inf }
 0x313   : > { %635 = vmax.xlane.f32.xlu0 %v634_v55 }
 0x317   : > { %v747_v56 = vpop.f32.mrb[12].mxu1 }
 0x318   : > { %v748_v57 = vadd.f32 %v747_v56, %v1202_v11  ;;  %v1030_v58 = vpop.f32.mrb[13].mxu1 }
 0x319   : > { %v750_v59 = vpop.f32.mrb[14].mxu1 }
 0x31a   : > { %v1031_v60 = vpop.f32.mrb[15].mxu1  ;;  %v753_v61 = vsel %vm347_vm1, %v748_v57, -inf }
 0x31b   : > { %754 = vmax.xlane.f32.xlu1 %v753_v61 }
 0x329   : > { %527 = vrot.lane.b32.xlu0 %v960_v62, %s1119_s8 }
 0x32c   : > { %646 = vrot.lane.b32.xlu1 %v960_v62, %s1122_s16 }
 0x398   : > { %v514_v63 = vpop.xlane.xlu1 %513 }
 0x399   : > { %v515_v1 = vsub.f32 %v507_v45, %v514_v63 }
 0x39b   : > { %v516_v2 = vmul.f32 1.442695, %v515_v1 }
 0x39d   : > { %1080 = vpow2.f32 %v516_v2 }
 0x3a0   : > { %v636_v3 = vpop.xlane.xlu0 %635 }
 0x3a1   : > { %v637_v4 = vsub.f32 %v629_v51, %v636_v3 }
 0x3a3   : > { %v638_v5 = vmul.f32 1.442695, %v637_v4 }
 0x3a4   : > { %v528_v15 = vpop.permute.xlu0 %527 }
 0x3a5   : > { %1082 = vpow2.f32 %v638_v5  ;;  %v533_v16 = vsel %vm409_vm3, %v528_v15, 0 }
 0x3a6   : > { %1009 = vmatpush3.bf16.msra.mxu0 %v533_v16 }
 0x3a7   : > { %v1081_v6 = vpop.eup %1080  ;;  %1020 = vmatprep.subr.bf16.mxu0 %v1116_v0 }
 0x3a8   : > { %v755_v7 = vpop.xlane.xlu1 %754  ;;  %v518_v8 = vsel %vm347_vm1, %v1081_v6, 0.0 }
 0x3a9   : > { %v756_v9 = vsub.f32 %v748_v57, %v755_v7  ;;  %519 = vadd.xlane.f32.xlu1 %v518_v8 }
 0x3ab   : > { %v757_v10 = vmul.f32 1.442695, %v756_v9 }
 0x3ac   : > { %v647_v17 = vpop.permute.xlu1 %646 }
 0x3ad   : > { %1084 = vpow2.f32 %v757_v10  ;;  %v652_v23 = vsel %vm409_vm3, %v647_v17, 0 }
 0x3af   : > { %v1083_v11 = vpop.eup %1082 }
 0x3b0   : > { %v640_v12 = vsel %vm347_vm1, %v1083_v11, 0.0 }
 0x3b1   : > { %641 = vadd.xlane.f32.xlu1 %v640_v12 }
 0x3b7   : > { %v1085_v13 = vpop.eup %1084 }
 0x3b8   : > { %v759_v14 = vsel %vm347_vm1, %v1085_v13, 0.0 }
 0x3b9   : > { %760 = vadd.xlane.f32.xlu1 %v759_v14 }
 0x3ca   : > { %765 = vrot.lane.b32.xlu1 %v960_v62, %s1121_s12 }
 0x436   : > { %v520_v18 = vpop.xlane.xlu1 %519 }
 0x437   : > { %1086 = vrcp.f32 %v520_v18 }
 0x43e   : > { %v642_v19 = vpop.xlane.xlu1 %641 }
 0x43f   : > { %1088 = vrcp.f32 %v642_v19 }
 0x441   : > { %v1087_v20 = vpop.eup %1086 }
 0x442   : > { %v522_v21 = vmul.f32 %v1087_v20, %v1081_v6 }
 0x444   : > { %v523_v22 = vpack.c.bf16 %v522_v21, %v522_v21 }
 0x446   : > { %v761_v24 = vpop.xlane.xlu1 %760  ;;  %1011 = vmatmul.mubr.msk.bf16.vlgmr.msra.gmra.mrb[4].mxu0 %vm347_vm1, %v523_v22 }
 0x447   : > { %1090 = vrcp.f32 %v761_v24  ;;  %1021 = vmatpush3.bf16.msra.mxu0 %v652_v23  ;;  %1022 = vmatprep.mubr.msk.bf16.mxu0 %vm1117_vm0, %v1116_v0 }
 0x448   : > { %1032 = vmatprep.subr.bf16.mxu0 %v1116_v0 }
 0x449   : > { %v1089_v25 = vpop.eup %1088 }
 0x44a   : > { %v644_v26 = vmul.f32 %v1089_v25, %v1083_v11  ;;  %v766_v27 = vpop.permute.xlu1 %765 }
 0x44b   : > { %v771_v28 = vsel %vm409_vm3, %v766_v27, 0 }
 0x44c   : > { %v645_v29 = vpack.c.bf16 %v644_v26, %v644_v26 }
 0x44e   : > { %1023 = vmatmul.mubr.msk.bf16.vlgmr.msra.gmra.mrb[8].mxu0 %vm347_vm1, %v645_v29 }
 0x44f   : > { %1033 = vmatpush3.bf16.msra.mxu0 %v771_v28  ;;  %1034 = vmatprep.mubr.msk.bf16.mxu0 %vm1117_vm0, %v1116_v0 }
 0x451   : > { %v1091_v30 = vpop.eup %1090 }
 0x452   : > { %v763_v31 = vmul.f32 %v1091_v30, %v1085_v13 }
 0x454   : > { %v764_v32 = vpack.c.bf16 %v763_v31, %v763_v31 }
 0x456   : > { %1035 = vmatmul.mubr.msk.bf16.vlgmr.msra.gmra.mrb[12].mxu0 %vm347_vm1, %v764_v32 }
 0x519   : > { %v569_v33 = vpop.f32.mrb[4].mxu0 }
 0x51a   : > { %v971_v34 = vpack.c.bf16 %v569_v33, %v569_v33  ;;  %v1012_v35 = vpop.f32.mrb[5].mxu0 }
 0x51b   : > { %v572_v36 = vpop.f32.mrb[6].mxu0 }
 0x51c   : > { %579 = vrot.lane.b32.xlu0 %v971_v34, %s1123_s22  ;;  %v1013_v37 = vpop.f32.mrb[7].mxu0 }
 0x521   : > { %v688_v38 = vpop.f32.mrb[8].mxu0 }
 0x522   : > { %v972_v39 = vpack.c.bf16 %v688_v38, %v688_v38  ;;  %v1024_v40 = vpop.f32.mrb[9].mxu0 }
 0x523   : > { %v691_v41 = vpop.f32.mrb[10].mxu0 }
 0x524   : > { %698 = vrot.lane.b32.xlu1 %v972_v39, %s1124_s24  ;;  %v1025_v0 = vpop.f32.mrb[11].mxu0 }
 0x529   : > { %v807_v42 = vpop.f32.mrb[12].mxu0 }
 0x52a   : > { %v973_v43 = vpack.c.bf16 %v807_v42, %v807_v42  ;;  %v1036_v44 = vpop.f32.mrb[13].mxu0 }
 0x52b   : > { %v810_v45 = vpop.f32.mrb[14].mxu0 }
 0x52c   : > { %817 = vrot.lane.b32.xlu0 %v973_v43, %s1125_s25  ;;  %v1037_v46 = vpop.f32.mrb[15].mxu0 }
 0x58e   : > { %v580_v47 = vpop.permute.xlu0 %579 }
 0x58f   : > { %583 = vst.msk [vmem:[%s1240_s23] sm:$0xf] %vm582_vm5, %v580_v47 }
 0x596   : > { %v699_v48 = vpop.permute.xlu1 %698 }
 0x597   : > { %702 = vst.msk [vmem:[%s1240_s23] sm:$0xf] %vm701_vm6, %v699_v48 }
 0x59e   : > { %v818_v49 = vpop.permute.xlu0 %817 }
 0x59f   : > { %821 = vst.msk [vmem:[%s1240_s23] sm:$0xf] %vm820_vm7, %v818_v49 }
 0x5a0 PF: > { %s15_s20 = sadd.s32 1, %s1114_s20   ;;  %s1287_s18 = smov %s1110_s19 }
 0x5a1   : > { %p12_p5 = scmp.ge.s32.totalorder %s15_s20, 4   ;;  %s1288_s19 = smov %s1290_s21 }
 0x5a3   :  { %14 = sbr.rel (!%p12_p5) target bundleno = 2 (0x2), region = 82 }

// kernel: transformer_forward.44
= control target key start
LH: loop header
LB: loop body
LE: loop exit
PB: predicated region body
PF: predicated region fallthrough
CT: control target
= control target key end

     0   :  { %v160_v0 = vmov 0.0   ;;  %vm161_vm0 = vmmov 0   ;;  %vm61_vm1 = vcmask 523264   ;;  %s203_s1 = inlined_call_operand.vmem [shape: bf16[64,128], index: 1, kind: input, shape index: {}]   ;;  %s204_s0 = inlined_call_operand.vmem [shape: bf16[16,64], index: 0, kind: input, shape index: {}]   ;;  %s205_s2 = inlined_call_operand.vmem [shape: f32[1,128], index: 2, kind: input, shape index: {}]   ;;  %s206_s3 = inlined_call_operand.vmem [shape: bf16[16,128], index: 3, kind: output, shape index: {}]  }
   0x1   :  { %141 = vmatprep.subr.bf16.mxu0 %v160_v0  ;;  %v155_v1 = vld [vmem:[%s203_s1] sm:$0xff]   ;;  %149 = vmatprep.mubr.msk.bf16.mxu0 %vm161_vm0, %v160_v0  ;;  %v156_v2 = vld [vmem:[%s203_s1 + $0x8] sm:$0xff]   ;;  %v157_v3 = vld [vmem:[%s203_s1 + $0x10] sm:$0xff]  }
   0x2   :  { %142 = vmatpush3.bf16.msra.mxu0 %v155_v1  ;;  %v158_v4 = vld [vmem:[%s203_s1 + $0x18] sm:$0xff]   ;;  %v159_v5 = vld [vmem:[%s204_s0] sm:$0xff]  }
   0x3   :  { %143 = vmatprep.subr.bf16.mxu0 %v160_v0  ;;  %v120_v6 = vld [vmem:[%s205_s2] ss:$0 sm:$0xff] }
   0x6   :  { %144 = vmatpush3.bf16.msra.mxu0 %v156_v2 }
   0x7   :  { %145 = vmatprep.subr.bf16.mxu0 %v160_v0 }
   0xa   :  { %146 = vmatpush3.bf16.msra.mxu0 %v157_v3 }
   0xb   :  { %147 = vmatprep.subr.bf16.mxu0 %v160_v0 }
   0xe   :  { %148 = vmatpush3.bf16.msra.mxu0 %v158_v4 }
  0x11   :  { %150 = vmatmul.mubr.msk.bf16.vlgmr.msra.gmra.mrb[0].mxu0 %vm61_vm1, %v159_v5 }
  0xe4   :  { %v99_v7 = vpop.f32.mrb[0].mxu0 }
  0xe5   :  { %v151_v8 = vpop.f32.mrb[1].mxu0  ;;  %v100_v10 = vadd.f32 %v120_v6, %v99_v7 }
  0xe6   :  { %v102_v9 = vpop.f32.mrb[2].mxu0 }
  0xe7   :  { %v103_v11 = vadd.f32 %v120_v6, %v102_v9  ;;  %v152_v12 = vpop.f32.mrb[3].mxu0 }
  0xe9   :  { %v134_v13 = vpack.c.bf16 %v103_v11, %v100_v10 }
  0xeb   :  { %135 = vst [vmem:[%s206_s3] sm:$0xff] %v134_v13  }

// kernel: transformer_forward.77
= control target key start
LH: loop header
LB: loop body
LE: loop exit
PB: predicated region body
PF: predicated region fallthrough
CT: control target
= control target key end

     0   :  { %v117_v0 = vmov 0.0   ;;  %vm118_vm0 = vmmov 0   ;;  %vm45_vm1 = vcmask 261120   ;;  %s157_s1 = inlined_call_operand.vmem [shape: bf16[32,128], index: 1, kind: input, shape index: {}]   ;;  %s158_s0 = inlined_call_operand.vmem [shape: bf16[16,32], index: 0, kind: input, shape index: {}]   ;;  %s159_s2 = inlined_call_operand.vmem [shape: f32[1,128], index: 2, kind: input, shape index: {}]   ;;  %s160_s3 = inlined_call_operand.vmem [shape: f32[16,128], index: 3, kind: output, shape index: {}]  }
   0x1   :  { %104 = vmatprep.subr.bf16.mxu0 %v117_v0  ;;  %v114_v1 = vld [vmem:[%s157_s1] sm:$0xff]   ;;  %108 = vmatprep.mubr.msk.bf16.mxu0 %vm118_vm0, %v117_v0  ;;  %v115_v2 = vld [vmem:[%s157_s1 + $0x8] sm:$0xff]  }
   0x2   :  { %105 = vmatpush3.bf16.msra.mxu0 %v114_v1  ;;  %v116_v3 = vld [vmem:[%s158_s0] sm:$0xff]  }
   0x3   :  { %106 = vmatprep.subr.bf16.mxu0 %v117_v0  ;;  %v96_v4 = vld [vmem:[%s159_s2] ss:$0 sm:$0xff] }
   0x6   :  { %107 = vmatpush3.bf16.msra.mxu0 %v115_v2 }
   0x9   :  { %109 = vmatmul.mubr.msk.bf16.vlgmr.msra.gmra.mrb[0].mxu0 %vm45_vm1, %v116_v3 }
  0xdc   :  { %v83_v5 = vpop.f32.mrb[0].mxu0 }
  0xdd   :  { %v84_v6 = vadd.f32 %v96_v4, %v83_v5  ;;  %v110_v7 = vpop.f32.mrb[1].mxu0 }
  0xde   :  { %v86_v8 = vpop.f32.mrb[2].mxu0 }
  0xdf   :  { %90 = vst [vmem:[%s160_s3] sm:$0xff] %v84_v6  ;;  %v87_v9 = vadd.f32 %v96_v4, %v86_v8  ;;  %v111_v10 = vpop.f32.mrb[3].mxu0 }
  0xe1   :  { %91 = vst [vmem:[%s160_s3 + $0x8] sm:$0xff] %v87_v9 }

// kernel: transformer_forward.54
= control target key start
LH: loop header
LB: loop body
LE: loop exit
PB: predicated region body
PF: predicated region fallthrough
CT: control target
= control target key end

     0   :  { %s1168_s18 = smov 0   ;;  %s1170_s19 = smov 0   ;;  %s1294_s0 = inlined_call_operand.vmem [shape: bf16[2,8,32], index: 0, kind: input, shape index: {}]   ;;  %s1295_s1 = inlined_call_operand.vmem [shape: bf16[2,8,32], index: 1, kind: input, shape index: {}]   ;;  %s1296_s2 = inlined_call_operand.vmem [shape: bf16[2,8,32], index: 2, kind: input, shape index: {}]   ;;  %s1297_s3 = inlined_call_operand.vmem [shape: f32[2,8,1], index: 3, kind: input, shape index: {}]   ;;  %s1298_s4 = inlined_call_operand.vmem [shape: f32[2,1,8], index: 4, kind: input, shape index: {}]   ;;  %s1299_s5 = inlined_call_operand.vmem [shape: bf16[2,8,32], index: 5, kind: output, shape index: {}]  }
   0x1   :  { %s1172_s20 = smov 0  }
   0x2 LB: > { %s27_s21 = sadd.s32 1, %s1122_s19  ;;  %p959_p0 = scmp.ge.s32.totalorder %s1126_s20, 1  ;;  %s1126_s20 = sphi %s1172_s20, %s15_s20   ;;  %s1122_s19 = sphi %s1170_s19, %s1301_s19   ;;  %s1118_s18 = sphi %s1168_s18, %s1300_s18  }
   0x3   : > { %p29_p1 = scmp.ge.s32.totalorder %s27_s21, 2  ;;  %p245_p2 = scmp.lt.s32.totalorder %s1126_s20, 3 }
   0x5   : > { %s1303_s21 = smov (%p29_p1, %s27_s21), 0  ;;  %p246_p3 = pnand %p959_p0, %p245_p2 }
   0x6   : > { %p295_p4 = scmp.lt.s32.totalorder (!%p246_p3), %s1118_s18, 1  ;;  %v1128_v0 = vmov (!%p246_p3), 0.0   ;;  %vm1129_vm0 = vmmov (!%p246_p3), 0   ;;  %v1130_v1 = vmov (!%p246_p3), 0   ;;  %vm358_vm1 = vcmask (!%p246_p3), 64512   ;;  %s1131_s8 = smov (!%p246_p3), 120  }
   0x7   : > { %249 = sbr.rel (%p246_p3) target bundleno = 1440 (0x5a0), region = 40  ;;  %1002 = vmatprep.subr.bf16.mxu0 (!%p246_p3), %v1128_v0  ;;  %1004 = vmatprep.mubr.msk.bf16.mxu0 (!%p246_p3), %vm1129_vm0, %v1128_v0  ;;  %v345_v7 = vlaneseq (!%p246_p3)  ;;  %v1132_v15 = vmov (!%p246_p3), -10000.0   ;;  %s1133_s12 = smov (!%p246_p3), 104   ;;  %vm420_vm4 = vcmask (!%p246_p3), 1043456   ;;  %vm465_vm5 = vcmask (!%p246_p3), 60416  }
   0x8   : > { %1084 = vset.pattern.permute.xlu0 (!%p246_p3), %v1130_v1  ;;  %1008 = vmatprep.subr.bf16.mxu1 (!%p246_p3), %v1128_v0  ;;  %s1134_s16 = smov (!%p246_p3), 112   ;;  %s1136_s24 = smov (!%p246_p3), 16   ;;  %vm593_vm6 = vcmask (!%p246_p3), 126016   ;;  %vm712_vm7 = vcmask (!%p246_p3), 191616   ;;  %vm831_vm8 = vcmask (!%p246_p3), 257216  }
   0x9   : > { %1010 = vmatprep.mubr.msk.bf16.mxu1 (!%p246_p3), %vm1129_vm0, %v1128_v0  ;;  %v346_v8 = vshrl.u32 (!%p246_p3), %v345_v7, 7  ;;  %v351_v9 = vand.u32 (!%p246_p3), 127, %v345_v7  ;;  %s1137_s25 = smov (!%p246_p3), 24  }
   0xb   : > { %vm352_vm2 = vcmp.le.s32.totalorder (!%p246_p3), %v351_v9, %v346_v8 }
   0xc   : > { %v966_v13 = vsel (!%p246_p3), %vm352_vm2, 1.0, %v1128_v0 }
   0xe   : > { %s1305_s18 = smov (!%p295_p4, %s1118_s18), 1 }
   0xf   : > { %s1192_s22 = sshll.u32 %s1305_s18, 2  ;;  %s963_s23 = sshll.u32 %s1305_s18, 3 }
  0x10   : > { %s305_s26 = scalar_lea.vmem %s1295_s1, %s1192_s22  ;;  %s316_s29 = scalar_lea.vmem %s1297_s3, %s963_s23 }
  0x11   : > { %v329_v2 = vld [vmem:[%s305_s26] sm:$0xf]  ;;  %s301_s7 = scalar_lea.vmem %s1294_s0, %s1192_s22  ;;  %s319_s11 = scalar_lea.vmem %s1298_s4, %s1305_s18 }
  0x12   : > { %v363_v3 = vsel %vm358_vm1, %v329_v2, 0  ;;  %v331_v4 = vld [vmem:[%s316_s29] sm:$0xff]  ;;  %v970_v6 = vcombine.low %v329_v2, %v329_v2  ;;  %s309_s15 = scalar_lea.vmem %s1296_s2, %s1192_s22  ;;  %s1253_s23 = scalar_lea.vmem %s1299_s5, %s1192_s22 }
  0x13   : > { %1003 = vmatpush3.bf16.xpose.msra.mxu0 %v363_v3  ;;  %335 = vperm.xlu0 %1084, %v331_v4   ;;  %v328_v5 = vld [vmem:[%s301_s7] sm:$0xf]  ;;  %s1135_s22 = smov 8  }
  0x14   : > { %1020 = vmatprep.subr.bf16.mxu0 %v1128_v0  ;;  %475 = vrot.lane.b32.xlu1 %v970_v6, %s1131_s8  ;;  %v965_v10 = vld [vmem:[%s319_s11] ss:$0 sm:$0xff]  ;;  %v969_v23 = vcombine.low %v328_v5, %v328_v5 }
  0x15   : > { %v1225_v29 = vld [vmem:[%s309_s15] sm:$0xf] }
  0x16   : > { %v422_v30 = vsel %vm420_vm4, %v1225_v29, 0  ;;  %v972_v4 = vcombine.low %v1225_v29, %v1225_v29 }
  0x17   : > { %1009 = vmatpush3.bf16.msra.mxu1 %v422_v30 }
  0x18   : > { %1014 = vmatprep.subr.bf16.mxu1 %v1128_v0 }
  0x1a   : > { %1005 = vmatmul.mubr.msk.bf16.vlgmr.msra.gmra.mrb[0].mxu0 %vm358_vm1, %v328_v5 }
  0x1b   : > { %1022 = vmatprep.mubr.msk.bf16.mxu0 %vm1129_vm0, %v1128_v0 }
  0x86   : > { %v476_v31 = vpop.permute.xlu1 %475 }
  0x87   : > { %v481_v38 = vsel %vm358_vm1, %v476_v31, 0 }
  0x92   : > { %v336_v11 = vpop.permute.xlu0 %335 }
  0x93   : > { %v344_v12 = vmul.f32 %v965_v10, %v336_v11 }
  0x95   : > { %v355_v14 = vmul.f32 %v966_v13, %v344_v12 }
  0x97   : > { %vm356_vm3 = vcmp.gt.f32.partialorder %v355_v14, 0.5 }
  0x98   : > { %v1215_v16 = vsel %vm356_vm3, 0.0, %v1132_v15 }
  0xed   : > { %v399_v17 = vpop.f32.mrb[0].mxu0 }
  0xee   : > { %v400_v18 = vadd.f32 %v399_v17, %v1215_v16  ;;  %v1006_v19 = vpop.f32.mrb[1].mxu0 }
  0xef   : > { %v402_v20 = vpop.f32.mrb[2].mxu0 }
  0xf0   : > { %v1007_v21 = vpop.f32.mrb[3].mxu0  ;;  %v405_v22 = vsel %vm358_vm1, %v400_v18, -inf }
  0xf1   : > { %406 = vmax.xlane.f32.xlu0 %v405_v22 }
 0x107   : > { %714 = vrot.lane.b32.xlu0 %v969_v23, %s1133_s12 }
 0x17e   : > { %v407_v24 = vpop.xlane.xlu0 %406 }
 0x17f   : > { %v408_v25 = vsub.f32 %v400_v18, %v407_v24 }
 0x181   : > { %v409_v26 = vmul.f32 1.442695, %v408_v25 }
 0x182   : > { %v715_v43 = vpop.permute.xlu0 %714 }
 0x183   : > { %1088 = vpow2.f32 %v409_v26 }
 0x18d   : > { %v1089_v27 = vpop.eup %1088 }
 0x18e   : > { %v411_v28 = vsel %vm358_vm1, %v1089_v27, 0.0 }
 0x18f   : > { %412 = vadd.xlane.f32.xlu1 %v411_v28 }
 0x1a0   : > { %470 = vrot.lane.b32.xlu1 %v969_v23, %s1131_s8 }
 0x1a4   : > { %597 = vrot.lane.b32.xlu1 %v970_v6, %s1134_s16 }
 0x1a8   : > { %595 = vrot.lane.b32.xlu1 %v969_v23, %s1134_s16 }
 0x1ac   : > { %716 = vrot.lane.b32.xlu1 %v970_v6, %s1133_s12 }
 0x21c   : > { %v413_v32 = vpop.xlane.xlu1 %412 }
 0x21d   : > { %1090 = vrcp.f32 %v413_v32 }
 0x220   : > { %v471_v33 = vpop.permute.xlu1 %470 }
 0x224   : > { %v598_v37 = vpop.permute.xlu1 %597 }
 0x225   : > { %v603_v40 = vsel %vm358_vm1, %v598_v37, 0 }
 0x227   : > { %v1091_v34 = vpop.eup %1090 }
 0x228   : > { %v415_v35 = vmul.f32 %v1091_v34, %v1089_v27  ;;  %v596_v39 = vpop.permute.xlu1 %595 }
 0x22a   : > { %v416_v36 = vpack.c.bf16 %v415_v35, %v415_v35 }
 0x22c   : > { %1011 = vmatmul.mubr.msk.bf16.vlgmr.msra.gmra.mrb[0].mxu1 %vm358_vm1, %v416_v36  ;;  %v717_v41 = vpop.permute.xlu1 %716 }
 0x22d   : > { %1015 = vmatpush3.bf16.xpose.msra.mxu1 %v481_v38  ;;  %1016 = vmatprep.mubr.msk.bf16.mxu1 %vm1129_vm0, %v1128_v0  ;;  %v722_v42 = vsel %vm358_vm1, %v717_v41, 0 }
 0x22e   : > { %1026 = vmatprep.subr.bf16.mxu1 %v1128_v0 }
 0x234   : > { %1017 = vmatmul.mubr.msk.bf16.vlgmr.msra.gmra.mrb[4].mxu1 %vm358_vm1, %v471_v33 }
 0x235   : > { %1027 = vmatpush3.bf16.xpose.msra.mxu1 %v603_v40  ;;  %1028 = vmatprep.mubr.msk.bf16.mxu1 %vm1129_vm0, %v1128_v0 }
 0x236   : > { %1038 = vmatprep.subr.bf16.mxu1 %v1128_v0 }
 0x23c   : > { %1029 = vmatmul.mubr.msk.bf16.vlgmr.msra.gmra.mrb[8].mxu1 %vm358_vm1, %v596_v39 }
 0x23d   : > { %1039 = vmatpush3.bf16.xpose.msra.mxu1 %v722_v42  ;;  %1040 = vmatprep.mubr.msk.bf16.mxu1 %vm1129_vm0, %v1128_v0 }
 0x244   : > { %1041 = vmatmul.mubr.msk.bf16.vlgmr.msra.gmra.mrb[12].mxu1 %vm358_vm1, %v715_v43 }
 0x2ff   : > { %v458_v44 = vpop.f32.mrb[0].mxu1 }
 0x300   : > { %v464_v45 = vpack.c.bf16 %v458_v44, %v458_v44  ;;  %v1012_v46 = vpop.f32.mrb[1].mxu1 }
 0x301   : > { %v461_v47 = vpop.f32.mrb[2].mxu1 }
 0x302   : > { %466 = vst.msk [vmem:[%s1253_s23] sm:$0xf] %vm465_vm5, %v464_v45  ;;  %v1013_v48 = vpop.f32.mrb[3].mxu1 }
 0x307   : > { %v517_v49 = vpop.f32.mrb[4].mxu1 }
 0x308   : > { %v518_v50 = vadd.f32 %v517_v49, %v1215_v16  ;;  %v1018_v51 = vpop.f32.mrb[5].mxu1 }
 0x309   : > { %v520_v52 = vpop.f32.mrb[6].mxu1 }
 0x30a   : > { %v1019_v53 = vpop.f32.mrb[7].mxu1  ;;  %v523_v54 = vsel %vm358_vm1, %v518_v50, -inf }
 0x30b   : > { %524 = vmax.xlane.f32.xlu1 %v523_v54 }
 0x30f   : > { %v639_v55 = vpop.f32.mrb[8].mxu1 }
 0x310   : > { %v640_v56 = vadd.f32 %v639_v55, %v1215_v16  ;;  %v1030_v57 = vpop.f32.mrb[9].mxu1 }
 0x311   : > { %v642_v58 = vpop.f32.mrb[10].mxu1 }
 0x312   : > { %v1031_v59 = vpop.f32.mrb[11].mxu1  ;;  %v645_v60 = vsel %vm358_vm1, %v640_v56, -inf }
 0x313   : > { %646 = vmax.xlane.f32.xlu0 %v645_v60 }
 0x317   : > { %v758_v61 = vpop.f32.mrb[12].mxu1 }
 0x318   : > { %v759_v62 = vadd.f32 %v758_v61, %v1215_v16  ;;  %v1042_v63 = vpop.f32.mrb[13].mxu1 }
 0x319   : > { %v761_v1 = vpop.f32.mrb[14].mxu1 }
 0x31a   : > { %v1043_v2 = vpop.f32.mrb[15].mxu1  ;;  %v764_v3 = vsel %vm358_vm1, %v759_v62, -inf }
 0x31b   : > { %765 = vmax.xlane.f32.xlu1 %v764_v3 }
 0x329   : > { %538 = vrot.lane.b32.xlu0 %v972_v4, %s1131_s8 }
 0x32c   : > { %657 = vrot.lane.b32.xlu1 %v972_v4, %s1134_s16 }
 0x398   : > { %v525_v5 = vpop.xlane.xlu1 %524 }
 0x399   : > { %v526_v6 = vsub.f32 %v518_v50, %v525_v5 }
 0x39b   : > { %v527_v7 = vmul.f32 1.442695, %v526_v6 }
 0x39d   : > { %1092 = vpow2.f32 %v527_v7 }
 0x3a0   : > { %v647_v8 = vpop.xlane.xlu0 %646 }
 0x3a1   : > { %v648_v9 = vsub.f32 %v640_v56, %v647_v8 }
 0x3a3   : > { %v649_v10 = vmul.f32 1.442695, %v648_v9 }
 0x3a4   : > { %v539_v20 = vpop.permute.xlu0 %538 }
 0x3a5   : > { %1094 = vpow2.f32 %v649_v10  ;;  %v544_v21 = vsel %vm420_vm4, %v539_v20, 0 }
 0x3a6   : > { %1021 = vmatpush3.bf16.msra.mxu0 %v544_v21 }
 0x3a7   : > { %v1093_v11 = vpop.eup %1092  ;;  %1032 = vmatprep.subr.bf16.mxu0 %v1128_v0 }
 0x3a8   : > { %v766_v12 = vpop.xlane.xlu1 %765  ;;  %v529_v13 = vsel %vm358_vm1, %v1093_v11, 0.0 }
 0x3a9   : > { %v767_v14 = vsub.f32 %v759_v62, %v766_v12  ;;  %530 = vadd.xlane.f32.xlu1 %v529_v13 }
 0x3ab   : > { %v768_v15 = vmul.f32 1.442695, %v767_v14 }
 0x3ac   : > { %v658_v22 = vpop.permute.xlu1 %657 }
 0x3ad   : > { %1096 = vpow2.f32 %v768_v15  ;;  %v663_v28 = vsel %vm420_vm4, %v658_v22, 0 }
 0x3af   : > { %v1095_v16 = vpop.eup %1094 }
 0x3b0   : > { %v651_v17 = vsel %vm358_vm1, %v1095_v16, 0.0 }
 0x3b1   : > { %652 = vadd.xlane.f32.xlu1 %v651_v17 }
 0x3b7   : > { %v1097_v18 = vpop.eup %1096 }
 0x3b8   : > { %v770_v19 = vsel %vm358_vm1, %v1097_v18, 0.0 }
 0x3b9   : > { %771 = vadd.xlane.f32.xlu1 %v770_v19 }
 0x3ca   : > { %776 = vrot.lane.b32.xlu1 %v972_v4, %s1133_s12 }
 0x436   : > { %v531_v23 = vpop.xlane.xlu1 %530 }
 0x437   : > { %1098 = vrcp.f32 %v531_v23 }
 0x43e   : > { %v653_v24 = vpop.xlane.xlu1 %652 }
 0x43f   : > { %1100 = vrcp.f32 %v653_v24 }
 0x441   : > { %v1099_v25 = vpop.eup %1098 }
 0x442   : > { %v533_v26 = vmul.f32 %v1099_v25, %v1093_v11 }
 0x444   : > { %v534_v27 = vpack.c.bf16 %v533_v26, %v533_v26 }
 0x446   : > { %v772_v29 = vpop.xlane.xlu1 %771  ;;  %1023 = vmatmul.mubr.msk.bf16.vlgmr.msra.gmra.mrb[4].mxu0 %vm358_vm1, %v534_v27 }
 0x447   : > { %1102 = vrcp.f32 %v772_v29  ;;  %1033 = vmatpush3.bf16.msra.mxu0 %v663_v28  ;;  %1034 = vmatprep.mubr.msk.bf16.mxu0 %vm1129_vm0, %v1128_v0 }
 0x448   : > { %1044 = vmatprep.subr.bf16.mxu0 %v1128_v0 }
 0x449   : > { %v1101_v30 = vpop.eup %1100 }
 0x44a   : > { %v655_v31 = vmul.f32 %v1101_v30, %v1095_v16  ;;  %v777_v32 = vpop.permute.xlu1 %776 }
 0x44b   : > { %v782_v33 = vsel %vm420_vm4, %v777_v32, 0 }
 0x44c   : > { %v656_v34 = vpack.c.bf16 %v655_v31, %v655_v31 }
 0x44e   : > { %1035 = vmatmul.mubr.msk.bf16.vlgmr.msra.gmra.mrb[8].mxu0 %vm358_vm1, %v656_v34 }
 0x44f   : > { %1045 = vmatpush3.bf16.msra.mxu0 %v782_v33  ;;  %1046 = vmatprep.mubr.msk.bf16.mxu0 %vm1129_vm0, %v1128_v0 }
 0x451   : > { %v1103_v35 = vpop.eup %1102 }
 0x452   : > { %v774_v36 = vmul.f32 %v1103_v35, %v1097_v18 }
 0x454   : > { %v775_v37 = vpack.c.bf16 %v774_v36, %v774_v36 }
 0x456   : > { %1047 = vmatmul.mubr.msk.bf16.vlgmr.msra.gmra.mrb[12].mxu0 %vm358_vm1, %v775_v37 }
 0x519   : > { %v580_v38 = vpop.f32.mrb[4].mxu0 }
 0x51a   : > { %v983_v39 = vpack.c.bf16 %v580_v38, %v580_v38  ;;  %v1024_v40 = vpop.f32.mrb[5].mxu0 }
 0x51b   : > { %v583_v41 = vpop.f32.mrb[6].mxu0 }
 0x51c   : > { %590 = vrot.lane.b32.xlu0 %v983_v39, %s1135_s22  ;;  %v1025_v42 = vpop.f32.mrb[7].mxu0 }
 0x521   : > { %v699_v43 = vpop.f32.mrb[8].mxu0 }
 0x522   : > { %v984_v44 = vpack.c.bf16 %v699_v43, %v699_v43  ;;  %v1036_v45 = vpop.f32.mrb[9].mxu0 }
 0x523   : > { %v702_v46 = vpop.f32.mrb[10].mxu0 }
 0x524   : > { %709 = vrot.lane.b32.xlu1 %v984_v44, %s1136_s24  ;;  %v1037_v0 = vpop.f32.mrb[11].mxu0 }
 0x529   : > { %v818_v47 = vpop.f32.mrb[12].mxu0 }
 0x52a   : > { %v985_v48 = vpack.c.bf16 %v818_v47, %v818_v47  ;;  %v1048_v49 = vpop.f32.mrb[13].mxu0 }
 0x52b   : > { %v821_v50 = vpop.f32.mrb[14].mxu0 }
 0x52c   : > { %828 = vrot.lane.b32.xlu0 %v985_v48, %s1137_s25  ;;  %v1049_v51 = vpop.f32.mrb[15].mxu0 }
 0x58e   : > { %v591_v52 = vpop.permute.xlu0 %590 }
 0x58f   : > { %594 = vst.msk [vmem:[%s1253_s23] sm:$0xf] %vm593_vm6, %v591_v52 }
 0x596   : > { %v710_v53 = vpop.permute.xlu1 %709 }
 0x597   : > { %713 = vst.msk [vmem:[%s1253_s23] sm:$0xf] %vm712_vm7, %v710_v53 }
 0x59e   : > { %v829_v54 = vpop.permute.xlu0 %828 }
 0x59f   : > { %832 = vst.msk [vmem:[%s1253_s23] sm:$0xf] %vm831_vm8, %v829_v54 }
 0x5a0 PF: > { %s15_s20 = sadd.s32 1, %s1126_s20   ;;  %s1300_s18 = smov %s1122_s19 }
 0x5a1   : > { %p12_p5 = scmp.ge.s32.totalorder %s15_s20, 4   ;;  %s1301_s19 = smov %s1303_s21 }
 0x5a3   :  { %14 = sbr.rel (!%p12_p5) target bundleno = 2 (0x2), region = 82 }

</bundles_post_ra>
